<compile_context>
chip_gen: v6e
topology: v6e:2x2x1
jax: 0.10.0
libtpu: 0.0.40
codegen_flags: <defaults>
</compile_context>

<pallas_src>
import functools

import jax
import jax.numpy as jnp
from jax import lax
from jax.experimental import pallas as pl
from jax.experimental.pallas import tpu as pltpu


def _round_up(x, m):
    return (x + m - 1) // m * m


def _vmem_capacity_bytes():
    """Per-TensorCore VMEM capacity; conservative (v7x) fallback if unknown."""
    try:
        cap = int(pltpu.get_tpu_info().vmem_capacity_bytes)
        if cap > 0:
            return cap
    except Exception:
        pass
    return 64 << 20


def _pick_block_b(batch, per_batch_bytes, budget):
    """Largest 8-aligned batch block inside `budget`, with >= 2 grid steps for
    non-tiny batches so a 2-TensorCore chip (v7x) can shard the parallel axis."""
    max_b = max(8, (int(budget // max(per_batch_bytes, 1)) // 8) * 8)
    if batch < 16 and batch * per_batch_bytes <= budget:
        return batch, batch                       # tiny batch: one block
    blk = min(max_b, _round_up(batch, 8))
    blk = max(8, (blk // 8) * 8)
    if _round_up(batch, blk) // blk < 2 and batch >= 16:
        blk = max(8, _round_up((batch + 1) // 2, 8))
    return blk, _round_up(batch, blk)


def _decision_kernel(agent_i, E, N, A, a_pad, n_pad, H, inv_n,
                     state_ref, aa_ref, ap_ref, alive_ref, amask_ref, emb_ref,
                     w1_ref, b1_ref, w2a_ref, b2a_ref, w2b_ref, b2b_ref,
                     w3a_ref, w3b_ref, b3_ref, w4_ref, b4_ref,
                     logit_ref, dsel_ref):
    f32 = jnp.float32
    bf16 = jnp.bfloat16
    blk_b = state_ref.shape[0]
    r_pad = a_pad + 2 * n_pad

    state = state_ref[...]                           # (blk_b, N, H)
    aa = aa_ref[...]                                 # active action embeds
    ap = ap_ref[...]                                 # passive action embeds
    alive = alive_ref[...]                           # (blk_b, N, 1)
    emb = emb_ref[...]                               # (E, H)

    # ---- fused gather/scatter input construction (torch index_select / scatter_add / cat)
    n_col = lax.broadcasted_iota(jnp.int32, (1, N, 1), 1)
    is_self = (n_col == agent_i).astype(f32)         # (1, N, 1)
    alive_ns = alive * (1.0 - is_self)               # alive & (agent != i), reused everywhere

    state_i = state[:, agent_i:agent_i + 1, :]       # (blk_b, 1, H)
    ap_i = ap[:, agent_i:agent_i + 1, :]
    alive_i = alive[:, agent_i:agent_i + 1, :]       # (blk_b, 1, 1)

    aa_corr = aa + is_self * ap_i                    # scatter_add onto active row E+i
    act_rows = [jnp.broadcast_to(emb[None, :, :], (blk_b, E, H)), aa_corr]
    if a_pad > A:
        act_rows.append(jnp.zeros((blk_b, a_pad - A, H), f32))
    act = state_i + jnp.concatenate(act_rows, axis=1)          # (blk_b, A_pad, H)

    p0 = state                                       # passive slot-0 inputs
    p1 = state + ap                                  # passive slot-1 inputs
    if n_pad > N:
        zp = jnp.zeros((blk_b, n_pad - N, H), f32)
        p0 = jnp.concatenate([p0, zp], axis=1)
        p1 = jnp.concatenate([p1, zp], axis=1)
    # 8-aligned segment boundaries -> the reshape below is layout preserving
    x = jnp.concatenate([act, p0, p1], axis=1).reshape(blk_b * r_pad, H)

    # ---- shared decision-encoder MLP: bf16 operands, f32 accumulation ----------
    h = jnp.maximum(jnp.dot(x.astype(bf16), w1_ref[...],
                            preferred_element_type=f32) + b1_ref[...], 0.0)
    hb = h.astype(bf16)
    ys = jnp.maximum(jnp.dot(hb, w2a_ref[...], preferred_element_type=f32) + b2a_ref[...], 0.0)
    ym = jnp.maximum(jnp.dot(hb, w2b_ref[...], preferred_element_type=f32) + b2b_ref[...], 0.0)
    ys3 = ys.reshape(blk_b, r_pad, H)                # mean-half decisions
    ym3 = ym.reshape(blk_b, r_pad, H)                # max-half decisions

    ad_s = ys3[:, :a_pad, :]
    p0_s = ys3[:, a_pad:a_pad + N, :]
    p1_s = ys3[:, a_pad + n_pad:a_pad + n_pad + N, :]
    ad_m = ym3[:, :a_pad, :]
    p0_m = ym3[:, a_pad:a_pad + N, :]
    p1_m = ym3[:, a_pad + n_pad:a_pad + n_pad + N, :]

    # ---- mean half (exact 3-term decomposition, H lanes only) -------------------
    pm0 = alive_ns * p0_s
    s0 = jnp.sum(pm0, axis=1, keepdims=True)                       # (blk_b, 1, H)
    dcorr = alive_ns * (p1_s - p0_s)                               # rows E..E+N-1 correction
    parts = []
    if E > 0:
        parts.append(jnp.zeros((blk_b, E, H), f32))
    parts.append(dcorr)
    if a_pad > A:
        parts.append(jnp.zeros((blk_b, a_pad - A, H), f32))
    avr = (s0 + jnp.concatenate(parts, axis=1) + alive_i * ad_s) * inv_n   # (blk_b, A_pad, H)

    # ---- max half (top-2 leave-one-out; every operand >= 0, so 0 is a safe pad) -
    pmax = alive_ns * p0_m                                         # (blk_b, N, H)
    m1 = jnp.max(pmax, axis=1, keepdims=True)
    at_max = (pmax == m1)
    nties = jnp.sum(at_max.astype(f32), axis=1, keepdims=True)
    m2 = jnp.max(jnp.where(at_max, 0.0, pmax), axis=1, keepdims=True)
    m_other = jnp.where(nties > 1.0, m1, m2)
    loo = jnp.where(at_max, m_other, m1)                           # max over agents != row
    prow = jnp.maximum(loo, alive_ns * p1_m)                       # rows E..E+N-1
    parts = []
    if E > 0:
        parts.append(jnp.broadcast_to(m1, (blk_b, E, H)))
    parts.append(prow)
    if a_pad > A:
        parts.append(jnp.broadcast_to(m1, (blk_b, a_pad - A, H)))
    mx = jnp.maximum(jnp.concatenate(parts, axis=1), alive_i * ad_m)       # (blk_b, A_pad, H)

    # ---- logit encoder: two H-wide matmuls + VPU multiply + lane reduction -----
    h3 = jnp.maximum(
        jnp.dot(avr.reshape(blk_b * a_pad, H).astype(bf16), w3a_ref[...],
                preferred_element_type=f32)
        + jnp.dot(mx.reshape(blk_b * a_pad, H).astype(bf16), w3b_ref[...],
                  preferred_element_type=f32)
        + b3_ref[...], 0.0)
    h3 = h3.reshape(blk_b, a_pad, H)
    logit = jnp.sum(h3 * w4_ref[...].reshape(1, 1, H), axis=-1) + b4_ref[0]   # (blk_b, A_pad)
    logit_ref[...] = logit

    # ---- in-kernel action selection + decision-row gather (no dec slab to HBM) -
    amask = amask_ref[...]                                         # (blk_b, A_pad)
    masked = logit - 1e9 * (1.0 - amask)
    mval = jnp.max(masked, axis=-1, keepdims=True)
    lane_idx = lax.broadcasted_iota(jnp.int32, (blk_b, a_pad), 1)
    sel = jnp.min(jnp.where(masked == mval, lane_idx, a_pad),
                  axis=-1, keepdims=True)                          # first argmax (blk_b, 1)
    row_idx = lax.broadcasted_iota(jnp.int32, (blk_b, a_pad, 1), 1)
    onehot = (row_idx == sel.reshape(blk_b, 1, 1)).astype(f32)     # (blk_b, A_pad, 1)
    dsel_a = jnp.sum(onehot * avr, axis=1)                         # (blk_b, H)
    dsel_m = jnp.sum(onehot * mx, axis=1)                          # (blk_b, H)
    dsel_ref[...] = jnp.concatenate([dsel_a, dsel_m], axis=-1)     # (blk_b, 2H)


def prepare_params(params):
    """One-time parameter prep: bf16 pre-cast + mean/max half splits."""
    H = params["w1"].shape[0]
    bf16 = jnp.bfloat16
    w2, b2, w3 = params["w2"], params["b2"], params["w3"]
    return {
        "emb": params["action_embed"][0, 0],                       # (E, H) f32
        "w1": params["w1"].astype(bf16), "b1": params["b1"],
        "w2a": w2[:, :H].astype(bf16), "b2a": b2[:, :H],
        "w2b": w2[:, H:].astype(bf16), "b2b": b2[:, H:],
        "w3a": w3[:H, :].astype(bf16), "w3b": w3[H:, :].astype(bf16),
        "b3": params["b3"],
        "w4": params["w4"].reshape(1, H), "b4": params["b4"].reshape((1,)),
    }


def decision_encoder_forward(prep, i, state, action_embed, alive_mask, action_mask,
                             action, update_state=True):
    B, N, H = state.shape
    E = prep["emb"].shape[0]
    A = E + N
    C2 = 2 * H
    A_pad = _round_up(A, 8)
    N_pad = _round_up(N, 8)
    R_pad = A_pad + 2 * N_pad

    aa = action_embed[..., :H]
    ap = action_embed[..., H:]
    alive_f = alive_mask.astype(jnp.float32).reshape(B, N, 1)

    # selection mask fed to the kernel: real action_mask (arg_max) or a one-hot
    # of the externally supplied action (so the kernel gathers exactly that row).
    if isinstance(action, dict):
        assert action["type"] == "arg_max"
        # TODO(synk): eps_greedy / boltzman samplers use torch.multinomial / torch.rand (stochastic).
        sel_mask = action_mask.astype(jnp.float32)
        provided = None
    else:
        provided = action.astype(jnp.int32)
        sel_mask = (provided[:, None] == jnp.arange(A, dtype=jnp.int32)[None, :]).astype(jnp.float32)
    if A_pad > A:
        sel_mask = jnp.pad(sel_mask, ((0, 0), (0, A_pad - A)))     # pad actions are never selected

    cap = _vmem_capacity_bytes()
    budget = (16 << 20) if cap <= (64 << 20) else (32 << 20)       # generation-aware block budget
    per_b = 4 * H * (6 * N + 5 * R_pad + 8 * A_pad)
    blk_b, b_pad = _pick_block_b(B, per_b, budget)

    def pad_b(x):
        if b_pad == B:
            return x
        return jnp.pad(x, [(0, b_pad - B)] + [(0, 0)] * (x.ndim - 1))

    kernel = functools.partial(_decision_kernel, int(i), E, N, A, A_pad, N_pad, H, 1.0 / N)
    logit_p, dsel_p = pl.pallas_call(
        kernel,
        out_shape=(jax.ShapeDtypeStruct((b_pad, A_pad), jnp.float32),
                   jax.ShapeDtypeStruct((b_pad, C2), jnp.float32)),
        grid=(b_pad // blk_b,),
        in_specs=[
            pl.BlockSpec((blk_b, N, H), lambda g: (g, 0, 0)),      # state
            pl.BlockSpec((blk_b, N, H), lambda g: (g, 0, 0)),      # active action embeds
            pl.BlockSpec((blk_b, N, H), lambda g: (g, 0, 0)),      # passive action embeds
            pl.BlockSpec((blk_b, N, 1), lambda g: (g, 0, 0)),      # alive mask
            pl.BlockSpec((blk_b, A_pad), lambda g: (g, 0)),        # selection mask
            pl.BlockSpec((E, H), lambda g: (0, 0)),                # self action-embed table
            pl.BlockSpec((H, H), lambda g: (0, 0)),                # w1 (bf16)
            pl.BlockSpec((1, H), lambda g: (0, 0)),                # b1
            pl.BlockSpec((H, H), lambda g: (0, 0)),                # w2 mean half (bf16)
            pl.BlockSpec((1, H), lambda g: (0, 0)),                # b2 mean half
            pl.BlockSpec((H, H), lambda g: (0, 0)),                # w2 max half (bf16)
            pl.BlockSpec((1, H), lambda g: (0, 0)),                # b2 max half
            pl.BlockSpec((H, H), lambda g: (0, 0)),                # w3 mean-half rows (bf16)
            pl.BlockSpec((H, H), lambda g: (0, 0)),                # w3 max-half rows (bf16)
            pl.BlockSpec((1, H), lambda g: (0, 0)),                # b3
            pl.BlockSpec((1, H), lambda g: (0, 0)),                # w4 as a row (VPU path)
            pl.BlockSpec(memory_space=pltpu.MemorySpace.SMEM),     # b4 scalar
        ],
        out_specs=(pl.BlockSpec((blk_b, A_pad), lambda g: (g, 0)),
                   pl.BlockSpec((blk_b, C2), lambda g: (g, 0))),
        compiler_params=pltpu.CompilerParams(
            dimension_semantics=("parallel",),                     # independent batch blocks
            vmem_limit_bytes=int(min(cap * 3 // 4, 96 << 20)),     # per-generation cap
        ),
    )(pad_b(state), pad_b(aa), pad_b(ap), pad_b(alive_f), pad_b(sel_mask),
      prep["emb"], prep["w1"], prep["b1"], prep["w2a"], prep["b2a"],
      prep["w2b"], prep["b2b"], prep["w3a"], prep["w3b"], prep["b3"],
      prep["w4"], prep["b4"])

    logit = logit_p[:B, :A]                                        # (B, A)
    dec_sel = dsel_p[:B].reshape(B, 1, C2)                         # (B, 1, 2H)

    if provided is None:
        masked_logit = logit - 1e9 * (1.0 - action_mask.astype(jnp.float32))
        action_out = jnp.argmax(masked_logit, axis=-1).astype(jnp.int32)
    else:
        action_out = provided

    new_state = state
    if update_state:
        emb = prep["emb"]
        emb_choice = emb[jnp.clip(action_out, 0, E - 1)]                              # (B, H)
        own_idx = jnp.broadcast_to(jnp.clip(action_out - E, 0, N - 1)[:, None, None], (B, 1, H))
        own_choice = jnp.take_along_axis(aa, own_idx, axis=1)[:, 0, :]                # (B, H)
        chosen_active = jnp.where((action_out < E)[:, None], emb_choice, own_choice)
        new_state = state.at[:, int(i), :].add(chosen_active)
        passive_sel = (action_out[:, None] == (E + jnp.arange(N))[None, :]).astype(state.dtype)
        new_state = new_state + ap * passive_sel[:, :, None]

    return new_state, dec_sel, logit, action_out


# ---------------- pure-JAX reference (mirrors the torch forward) ----------------
def _mlp_ref(x, w1, b1, w2, b2):
    h = jax.nn.relu(x @ w1 + b1)
    return jax.nn.relu(h @ w2 + b2)


def reference_forward(params, i, state, action_embed, alive_mask, action_mask,
                      action, update_state=True):
    B, N, H = state.shape
    E = params["action_embed"].shape[2]
    A = E + N
    act_active = action_embed[..., :H]
    act_passive = action_embed[..., H:]
    active_self = jnp.broadcast_to(params["action_embed"], (B, 1, E, H))
    active_embed_ = jnp.concatenate([active_self, act_active[:, None]], axis=2)      # (B,1,A,H)
    active_embed = active_embed_.at[:, 0, E + i, :].add(act_passive[:, i, :])
    passive_embed = jnp.concatenate(
        [jnp.zeros((B, N, 1, H), state.dtype), act_passive[:, :, None, :]], axis=2)  # (B,N,2,H)
    active_state = state[:, i][:, None, None, :] + active_embed
    passive_state = state[:, :, None, :] + passive_embed
    ad = _mlp_ref(active_state, params["w1"], params["b1"], params["w2"], params["b2"])
    pd = _mlp_ref(passive_state, params["w1"], params["b1"], params["w2"], params["b2"])
    sel = (jnp.arange(A)[None, :] == (E + jnp.arange(N))[:, None])                    # (N, A)
    decision = jnp.where(sel[None, :, :, None], pd[:, :, 1:2, :], pd[:, :, 0:1, :])   # (B,N,A,2H)
    decision = decision.at[:, i, :, :].set(ad[:, 0])
    am = alive_mask.astype(state.dtype)[:, :, None, None]
    dec_avr = (decision[..., :H] * am).mean(1)
    dec_max = (decision[..., H:] * am).max(1)
    dec = jnp.concatenate([dec_avr, dec_max], axis=-1)                                # (B,A,2H)
    h = jax.nn.relu(dec @ params["w3"] + params["b3"])
    logit = (h @ params["w4"] + params["b4"])[..., 0]
    if isinstance(action, dict):
        masked_logit = logit - 1e9 * (1.0 - action_mask.astype(jnp.float32))
        action = jnp.argmax(masked_logit, axis=-1).astype(jnp.int32)
    new_state = state
    if update_state:
        idx_h = jnp.broadcast_to(action[:, None, None, None], (B, 1, 1, H))
        chosen = jnp.take_along_axis(active_embed_, idx_h, axis=2)[:, 0, 0, :]
        new_state = state.at[:, i, :].add(chosen)
        passive_sel = (action[:, None] == (E + jnp.arange(N))[None, :]).astype(state.dtype)
        new_state = new_state + act_passive * passive_sel[:, :, None]
    idx_c = jnp.broadcast_to(action[:, None, None], (B, 1, 2 * H))
    dec_sel = jnp.take_along_axis(dec, idx_c, axis=1)
    return new_state, dec_sel, logit, action


if __name__ == "__main__":
    B, N, H, E = 2, 4, 32, 6          # batch, agent_num, hidden_len, embed_num
    A = E + N
    i = 1                             # active agent id
    key = jax.random.PRNGKey(0)
    ks = jax.random.split(key, 12)
    params = {
        "action_embed": jax.random.normal(ks[0], (1, 1, E, H), jnp.float32) * (2.0 / (E * H)) ** 0.5,
        "w1": jax.random.normal(ks[1], (H, H), jnp.float32) / H ** 0.5,
        "b1": jax.random.normal(ks[2], (1, H), jnp.float32) * 0.1,
        "w2": jax.random.normal(ks[3], (H, 2 * H), jnp.float32) / H ** 0.5,
        "b2": jax.random.normal(ks[4], (1, 2 * H), jnp.float32) * 0.1,
        "w3": jax.random.normal(ks[5], (2 * H, H), jnp.float32) / (2 * H) ** 0.5,
        "b3": jax.random.normal(ks[6], (1, H), jnp.float32) * 0.1,
        "w4": jax.random.normal(ks[7], (H, 1), jnp.float32) / H ** 0.5,
        "b4": jax.random.normal(ks[8], (1, 1), jnp.float32) * 0.1,
    }
    state = jax.random.normal(ks[9], (B, N, H), jnp.float32)
    action_embed = jax.random.normal(ks[10], (B, N, 2 * H), jnp.float32)
    alive_mask = jnp.array([[1.0, 1.0, 0.0, 1.0],
                            [1.0, 1.0, 1.0, 1.0]], jnp.float32)
    action_mask = jnp.ones((B, A), jnp.float32).at[0, 3].set(0.0).at[1, 7].set(0.0)
    action_cfg = {"type": "arg_max"}

    prep = prepare_params(params)

    out = decision_encoder_forward(prep, i, state, action_embed, alive_mask,
                                   action_mask, action_cfg)
    out = jax.block_until_ready(out)
    ref = reference_forward(params, i, state, action_embed, alive_mask,
                            action_mask, action_cfg)
    ref = jax.block_until_ready(ref)

    # logits: kernel uses bf16 matmuls (f32 accumulation) vs pure-f32 reference.
    assert jnp.allclose(out[2], ref[2], rtol=5e-2, atol=5e-2)

    # argmax action must match unless the reference logits are a near-tie.
    act_k, act_r = out[3], ref[3]
    if not bool(jnp.array_equal(act_k, act_r)):
        gap = jnp.abs(jnp.take_along_axis(ref[2], act_k[:, None], axis=1)
                      - jnp.take_along_axis(ref[2], act_r[:, None], axis=1))
        assert bool(jnp.all(gap < 5e-2)), "argmax mismatch beyond bf16 tolerance"

    # deterministic path: feed the reference's sampled action into both forwards.
    out_f = decision_encoder_forward(prep, i, state, action_embed, alive_mask,
                                     action_mask, act_r)
    out_f = jax.block_until_ready(out_f)
    ref_f = reference_forward(params, i, state, action_embed, alive_mask,
                              action_mask, act_r)
    ref_f = jax.block_until_ready(ref_f)
    for got, want in zip(out_f[:3], ref_f[:3]):
        assert jnp.allclose(got, want, rtol=5e-2, atol=5e-2)
    assert jnp.array_equal(out_f[3], act_r)

    print("KERNEL_OK")
</pallas_src>

<mosaic_0001>
module attributes {stable_mosaic.version = 11 : i64} {
  func.func @_decision_kernel(%arg0: i32, %arg1: memref<2x4x32xf32, #tpu.memory_space<vmem>>, %arg2: memref<2x4x32xf32, #tpu.memory_space<vmem>>, %arg3: memref<2x4x32xf32, #tpu.memory_space<vmem>>, %arg4: memref<2x4x1xf32, #tpu.memory_space<vmem>>, %arg5: memref<2x16xf32, #tpu.memory_space<vmem>>, %arg6: memref<6x32xf32, #tpu.memory_space<vmem>>, %arg7: memref<32x32xbf16, #tpu.memory_space<vmem>>, %arg8: memref<1x32xf32, #tpu.memory_space<vmem>>, %arg9: memref<32x32xbf16, #tpu.memory_space<vmem>>, %arg10: memref<1x32xf32, #tpu.memory_space<vmem>>, %arg11: memref<32x32xbf16, #tpu.memory_space<vmem>>, %arg12: memref<1x32xf32, #tpu.memory_space<vmem>>, %arg13: memref<32x32xbf16, #tpu.memory_space<vmem>>, %arg14: memref<32x32xbf16, #tpu.memory_space<vmem>>, %arg15: memref<1x32xf32, #tpu.memory_space<vmem>>, %arg16: memref<1x32xf32, #tpu.memory_space<vmem>>, %arg17: memref<1xf32, #tpu.memory_space<smem>>, %arg18: memref<2x16xf32, #tpu.memory_space<vmem>>, %arg19: memref<2x64xf32, #tpu.memory_space<vmem>>) attributes {dimension_semantics = [#tpu.dimension_semantics<parallel>], iteration_bounds = array<i64: 1>, scalar_prefetch = 0 : i64, scratch_operands = 0 : i64, tpu.core_type = #tpu.core_type<tc>, window_params = [{transform_indices = @transform_0, window_bounds = array<i64: 2, 4, 32>}, {transform_indices = @transform_1, window_bounds = array<i64: 2, 4, 32>}, {transform_indices = @transform_2, window_bounds = array<i64: 2, 4, 32>}, {transform_indices = @transform_3, window_bounds = array<i64: 2, 4, 1>}, {transform_indices = @transform_4, window_bounds = array<i64: 2, 16>}, {pipeline_mode = #tpu.pipeline_mode<synchronous>, transform_indices = @transform_5, window_bounds = array<i64: 6, 32>}, {pipeline_mode = #tpu.pipeline_mode<synchronous>, transform_indices = @transform_6, window_bounds = array<i64: 32, 32>}, {pipeline_mode = #tpu.pipeline_mode<synchronous>, transform_indices = @transform_7, window_bounds = array<i64: 1, 32>}, {pipeline_mode = #tpu.pipeline_mode<synchronous>, transform_indices = @transform_8, window_bounds = array<i64: 32, 32>}, {pipeline_mode = #tpu.pipeline_mode<synchronous>, transform_indices = @transform_9, window_bounds = array<i64: 1, 32>}, {pipeline_mode = #tpu.pipeline_mode<synchronous>, transform_indices = @transform_10, window_bounds = array<i64: 32, 32>}, {pipeline_mode = #tpu.pipeline_mode<synchronous>, transform_indices = @transform_11, window_bounds = array<i64: 1, 32>}, {pipeline_mode = #tpu.pipeline_mode<synchronous>, transform_indices = @transform_12, window_bounds = array<i64: 32, 32>}, {pipeline_mode = #tpu.pipeline_mode<synchronous>, transform_indices = @transform_13, window_bounds = array<i64: 32, 32>}, {pipeline_mode = #tpu.pipeline_mode<synchronous>, transform_indices = @transform_14, window_bounds = array<i64: 1, 32>}, {pipeline_mode = #tpu.pipeline_mode<synchronous>, transform_indices = @transform_15, window_bounds = array<i64: 1, 32>}, {transform_indices = @transform_16, window_bounds = array<i64: 1>}, {transform_indices = @transform_17, window_bounds = array<i64: 2, 16>}, {transform_indices = @transform_18, window_bounds = array<i64: 2, 64>}]} {
    %c0 = arith.constant 0 : index
    %c0_0 = arith.constant 0 : index
    %c0_1 = arith.constant 0 : index
    %0 = vector.load %arg1[%c0, %c0_0, %c0_1] : memref<2x4x32xf32, #tpu.memory_space<vmem>>, vector<2x4x32xf32>
    %c0_2 = arith.constant 0 : index
    %c0_3 = arith.constant 0 : index
    %c0_4 = arith.constant 0 : index
    %1 = vector.load %arg2[%c0_2, %c0_3, %c0_4] : memref<2x4x32xf32, #tpu.memory_space<vmem>>, vector<2x4x32xf32>
    %c0_5 = arith.constant 0 : index
    %c0_6 = arith.constant 0 : index
    %c0_7 = arith.constant 0 : index
    %2 = vector.load %arg3[%c0_5, %c0_6, %c0_7] : memref<2x4x32xf32, #tpu.memory_space<vmem>>, vector<2x4x32xf32>
    %c0_8 = arith.constant 0 : index
    %c0_9 = arith.constant 0 : index
    %c0_10 = arith.constant 0 : index
    %3 = vector.load %arg4[%c0_8, %c0_9, %c0_10] : memref<2x4x1xf32, #tpu.memory_space<vmem>>, vector<2x4x1xf32>
    %c0_11 = arith.constant 0 : index
    %c0_12 = arith.constant 0 : index
    %4 = vector.load %arg6[%c0_11, %c0_12] : memref<6x32xf32, #tpu.memory_space<vmem>>, vector<6x32xf32>
    %5 = tpu.iota {dimensions = array<i32: 1>} : vector<1x4x1xi32>
    %c1_i32 = arith.constant 1 : i32
    %6 = vector.broadcast %c1_i32 : i32 to vector<1x4x1xi32>
    %7 = arith.cmpi eq, %5, %6 : vector<1x4x1xi32>
    %8 = arith.extui %7 : vector<1x4x1xi1> to vector<1x4x1xi32>
    %9 = arith.sitofp %8 : vector<1x4x1xi32> to vector<1x4x1xf32>
    %cst = arith.constant 1.000000e+00 : f32
    %10 = vector.broadcast %cst : f32 to vector<1x4x1xf32>
    %11 = arith.subf %10, %9 : vector<1x4x1xf32>
    %12 = vector.broadcast %11 : vector<1x4x1xf32> to vector<2x4x1xf32>
    %13 = arith.mulf %3, %12 : vector<2x4x1xf32>
    %14 = vector.extract_strided_slice %0 {offsets = [0, 1, 0], sizes = [2, 1, 32], strides = [1, 1, 1]} : vector<2x4x32xf32> to vector<2x1x32xf32>
    %15 = vector.extract_strided_slice %2 {offsets = [0, 1, 0], sizes = [2, 1, 32], strides = [1, 1, 1]} : vector<2x4x32xf32> to vector<2x1x32xf32>
    %16 = vector.extract_strided_slice %3 {offsets = [0, 1, 0], sizes = [2, 1, 1], strides = [1, 1, 1]} : vector<2x4x1xf32> to vector<2x1x1xf32>
    %17 = vector.broadcast %9 : vector<1x4x1xf32> to vector<2x4x32xf32>
    %18 = vector.broadcast %15 : vector<2x1x32xf32> to vector<2x4x32xf32>
    %19 = arith.mulf %17, %18 : vector<2x4x32xf32>
    %20 = arith.addf %1, %19 : vector<2x4x32xf32>
    %21 = vector.shape_cast %4 : vector<6x32xf32> to vector<1x6x32xf32>
    %22 = vector.shape_cast %21 : vector<1x6x32xf32> to vector<1x6x32xf32>
    %23 = vector.broadcast %22 : vector<1x6x32xf32> to vector<2x6x32xf32>
    %cst_13 = arith.constant 0.000000e+00 : f32
    %24 = vector.broadcast %cst_13 : f32 to vector<2x6x32xf32>
    %25 = tpu.concatenate %23, %20, %24 in 1 : vector<2x6x32xf32>, vector<2x4x32xf32>, vector<2x6x32xf32> -> vector<2x16x32xf32>
    %26 = vector.broadcast %14 : vector<2x1x32xf32> to vector<2x16x32xf32>
    %27 = arith.addf %26, %25 : vector<2x16x32xf32>
    %28 = arith.addf %0, %2 : vector<2x4x32xf32>
    %cst_14 = arith.constant 0.000000e+00 : f32
    %29 = vector.broadcast %cst_14 : f32 to vector<2x4x32xf32>
    %30 = tpu.concatenate %0, %29 in 1 : vector<2x4x32xf32>, vector<2x4x32xf32> -> vector<2x8x32xf32>
    %31 = tpu.concatenate %28, %29 in 1 : vector<2x4x32xf32>, vector<2x4x32xf32> -> vector<2x8x32xf32>
    %32 = tpu.concatenate %27, %30, %31 in 1 : vector<2x16x32xf32>, vector<2x8x32xf32>, vector<2x8x32xf32> -> vector<2x32x32xf32>
    %33 = vector.shape_cast %32 : vector<2x32x32xf32> to vector<64x32xf32>
    %34 = arith.truncf %33 : vector<64x32xf32> to vector<64x32xbf16>
    %c0_15 = arith.constant 0 : index
    %c0_16 = arith.constant 0 : index
    %35 = vector.load %arg7[%c0_15, %c0_16] : memref<32x32xbf16, #tpu.memory_space<vmem>>, vector<32x32xbf16>
    %cst_17 = arith.constant dense<0.000000e+00> : vector<64x32xf32>
    %36 = tpu.matmul %34, %35, %cst_17 {dimension_numbers = #tpu.dot_dimension_numbers<[1], [0], [0], [1], [0, 0, 1, 1], [], []>} : vector<64x32xbf16>, vector<32x32xbf16>, vector<64x32xf32> -> vector<64x32xf32>
    %c0_18 = arith.constant 0 : index
    %c0_19 = arith.constant 0 : index
    %37 = vector.load %arg8[%c0_18, %c0_19] : memref<1x32xf32, #tpu.memory_space<vmem>>, vector<1x32xf32>
    %38 = vector.broadcast %37 : vector<1x32xf32> to vector<64x32xf32>
    %39 = arith.addf %36, %38 : vector<64x32xf32>
    %cst_20 = arith.constant 0.000000e+00 : f32
    %40 = vector.broadcast %cst_20 : f32 to vector<64x32xf32>
    %41 = arith.maximumf %39, %40 : vector<64x32xf32>
    %42 = arith.truncf %41 : vector<64x32xf32> to vector<64x32xbf16>
    %c0_21 = arith.constant 0 : index
    %c0_22 = arith.constant 0 : index
    %43 = vector.load %arg9[%c0_21, %c0_22] : memref<32x32xbf16, #tpu.memory_space<vmem>>, vector<32x32xbf16>
    %cst_23 = arith.constant dense<0.000000e+00> : vector<64x32xf32>
    %44 = tpu.matmul %42, %43, %cst_23 {dimension_numbers = #tpu.dot_dimension_numbers<[1], [0], [0], [1], [0, 0, 1, 1], [], []>} : vector<64x32xbf16>, vector<32x32xbf16>, vector<64x32xf32> -> vector<64x32xf32>
    %c0_24 = arith.constant 0 : index
    %c0_25 = arith.constant 0 : index
    %45 = vector.load %arg10[%c0_24, %c0_25] : memref<1x32xf32, #tpu.memory_space<vmem>>, vector<1x32xf32>
    %46 = vector.broadcast %45 : vector<1x32xf32> to vector<64x32xf32>
    %47 = arith.addf %44, %46 : vector<64x32xf32>
    %cst_26 = arith.constant 0.000000e+00 : f32
    %48 = vector.broadcast %cst_26 : f32 to vector<64x32xf32>
    %49 = arith.maximumf %47, %48 : vector<64x32xf32>
    %c0_27 = arith.constant 0 : index
    %c0_28 = arith.constant 0 : index
    %50 = vector.load %arg11[%c0_27, %c0_28] : memref<32x32xbf16, #tpu.memory_space<vmem>>, vector<32x32xbf16>
    %cst_29 = arith.constant dense<0.000000e+00> : vector<64x32xf32>
    %51 = tpu.matmul %42, %50, %cst_29 {dimension_numbers = #tpu.dot_dimension_numbers<[1], [0], [0], [1], [0, 0, 1, 1], [], []>} : vector<64x32xbf16>, vector<32x32xbf16>, vector<64x32xf32> -> vector<64x32xf32>
    %c0_30 = arith.constant 0 : index
    %c0_31 = arith.constant 0 : index
    %52 = vector.load %arg12[%c0_30, %c0_31] : memref<1x32xf32, #tpu.memory_space<vmem>>, vector<1x32xf32>
    %53 = vector.broadcast %52 : vector<1x32xf32> to vector<64x32xf32>
    %54 = arith.addf %51, %53 : vector<64x32xf32>
    %cst_32 = arith.constant 0.000000e+00 : f32
    %55 = vector.broadcast %cst_32 : f32 to vector<64x32xf32>
    %56 = arith.maximumf %54, %55 : vector<64x32xf32>
    %57 = vector.shape_cast %49 : vector<64x32xf32> to vector<2x32x32xf32>
    %58 = vector.shape_cast %56 : vector<64x32xf32> to vector<2x32x32xf32>
    %59 = vector.extract_strided_slice %57 {offsets = [0, 0, 0], sizes = [2, 16, 32], strides = [1, 1, 1]} : vector<2x32x32xf32> to vector<2x16x32xf32>
    %60 = vector.extract_strided_slice %57 {offsets = [0, 16, 0], sizes = [2, 4, 32], strides = [1, 1, 1]} : vector<2x32x32xf32> to vector<2x4x32xf32>
    %61 = vector.extract_strided_slice %57 {offsets = [0, 24, 0], sizes = [2, 4, 32], strides = [1, 1, 1]} : vector<2x32x32xf32> to vector<2x4x32xf32>
    %62 = vector.extract_strided_slice %58 {offsets = [0, 0, 0], sizes = [2, 16, 32], strides = [1, 1, 1]} : vector<2x32x32xf32> to vector<2x16x32xf32>
    %63 = vector.extract_strided_slice %58 {offsets = [0, 16, 0], sizes = [2, 4, 32], strides = [1, 1, 1]} : vector<2x32x32xf32> to vector<2x4x32xf32>
    %64 = vector.extract_strided_slice %58 {offsets = [0, 24, 0], sizes = [2, 4, 32], strides = [1, 1, 1]} : vector<2x32x32xf32> to vector<2x4x32xf32>
    %65 = vector.broadcast %13 : vector<2x4x1xf32> to vector<2x4x32xf32>
    %66 = arith.mulf %65, %60 : vector<2x4x32xf32>
    %cst_33 = arith.constant dense<0.000000e+00> : vector<2x32xf32>
    %67 = vector.multi_reduction <add>, %66, %cst_33 [1] : vector<2x4x32xf32> to vector<2x32xf32>
    %68 = vector.shape_cast %67 : vector<2x32xf32> to vector<2x1x32xf32>
    %69 = arith.subf %61, %60 : vector<2x4x32xf32>
    %70 = vector.broadcast %13 : vector<2x4x1xf32> to vector<2x4x32xf32>
    %71 = arith.mulf %70, %69 : vector<2x4x32xf32>
    %cst_34 = arith.constant 0.000000e+00 : f32
    %72 = vector.broadcast %cst_34 : f32 to vector<2x6x32xf32>
    %cst_35 = arith.constant 0.000000e+00 : f32
    %73 = vector.broadcast %cst_35 : f32 to vector<2x6x32xf32>
    %74 = tpu.concatenate %72, %71, %73 in 1 : vector<2x6x32xf32>, vector<2x4x32xf32>, vector<2x6x32xf32> -> vector<2x16x32xf32>
    %75 = vector.broadcast %68 : vector<2x1x32xf32> to vector<2x16x32xf32>
    %76 = arith.addf %75, %74 : vector<2x16x32xf32>
    %77 = vector.broadcast %16 : vector<2x1x1xf32> to vector<2x16x32xf32>
    %78 = arith.mulf %77, %59 : vector<2x16x32xf32>
    %79 = arith.addf %76, %78 : vector<2x16x32xf32>
    %cst_36 = arith.constant 2.500000e-01 : f32
    %80 = vector.broadcast %cst_36 : f32 to vector<2x16x32xf32>
    %81 = arith.mulf %79, %80 : vector<2x16x32xf32>
    %82 = vector.broadcast %13 : vector<2x4x1xf32> to vector<2x4x32xf32>
    %83 = arith.mulf %82, %63 : vector<2x4x32xf32>
    %cst_37 = arith.constant dense<0xFF800000> : vector<2x32xf32>
    %84 = vector.multi_reduction <maximumf>, %83, %cst_37 [1] : vector<2x4x32xf32> to vector<2x32xf32>
    %85 = vector.shape_cast %84 : vector<2x32xf32> to vector<2x1x32xf32>
    %86 = vector.broadcast %85 : vector<2x1x32xf32> to vector<2x4x32xf32>
    %87 = arith.cmpf oeq, %83, %86 : vector<2x4x32xf32>
    %88 = arith.extui %87 : vector<2x4x32xi1> to vector<2x4x32xi32>
    %89 = arith.sitofp %88 : vector<2x4x32xi32> to vector<2x4x32xf32>
    %cst_38 = arith.constant dense<0.000000e+00> : vector<2x32xf32>
    %90 = vector.multi_reduction <add>, %89, %cst_38 [1] : vector<2x4x32xf32> to vector<2x32xf32>
    %91 = vector.shape_cast %90 : vector<2x32xf32> to vector<2x1x32xf32>
    %cst_39 = arith.constant 0.000000e+00 : f32
    %92 = vector.broadcast %cst_39 : f32 to vector<2x4x32xf32>
    %93 = arith.select %87, %92, %83 : vector<2x4x32xi1>, vector<2x4x32xf32>
    %cst_40 = arith.constant dense<0xFF800000> : vector<2x32xf32>
    %94 = vector.multi_reduction <maximumf>, %93, %cst_40 [1] : vector<2x4x32xf32> to vector<2x32xf32>
    %95 = vector.shape_cast %94 : vector<2x32xf32> to vector<2x1x32xf32>
    %cst_41 = arith.constant 1.000000e+00 : f32
    %96 = vector.broadcast %cst_41 : f32 to vector<2x1x32xf32>
    %97 = arith.cmpf ogt, %91, %96 : vector<2x1x32xf32>
    %98 = arith.select %97, %85, %95 : vector<2x1x32xi1>, vector<2x1x32xf32>
    %99 = vector.shape_cast %98 : vector<2x1x32xf32> to vector<2x1x32xf32>
    %100 = vector.broadcast %99 : vector<2x1x32xf32> to vector<2x4x32xf32>
    %101 = vector.shape_cast %85 : vector<2x1x32xf32> to vector<2x1x32xf32>
    %102 = vector.broadcast %101 : vector<2x1x32xf32> to vector<2x4x32xf32>
    %103 = arith.select %87, %100, %102 : vector<2x4x32xi1>, vector<2x4x32xf32>
    %104 = vector.broadcast %13 : vector<2x4x1xf32> to vector<2x4x32xf32>
    %105 = arith.mulf %104, %64 : vector<2x4x32xf32>
    %106 = arith.maximumf %103, %105 : vector<2x4x32xf32>
    %107 = vector.shape_cast %85 : vector<2x1x32xf32> to vector<2x1x32xf32>
    %108 = vector.broadcast %107 : vector<2x1x32xf32> to vector<2x6x32xf32>
    %109 = vector.shape_cast %85 : vector<2x1x32xf32> to vector<2x1x32xf32>
    %110 = vector.broadcast %109 : vector<2x1x32xf32> to vector<2x6x32xf32>
    %111 = tpu.concatenate %108, %106, %110 in 1 : vector<2x6x32xf32>, vector<2x4x32xf32>, vector<2x6x32xf32> -> vector<2x16x32xf32>
    %112 = vector.broadcast %16 : vector<2x1x1xf32> to vector<2x16x32xf32>
    %113 = arith.mulf %112, %62 : vector<2x16x32xf32>
    %114 = arith.maximumf %111, %113 : vector<2x16x32xf32>
    %115 = vector.shape_cast %81 : vector<2x16x32xf32> to vector<32x32xf32>
    %116 = arith.truncf %115 : vector<32x32xf32> to vector<32x32xbf16>
    %c0_42 = arith.constant 0 : index
    %c0_43 = arith.constant 0 : index
    %117 = vector.load %arg13[%c0_42, %c0_43] : memref<32x32xbf16, #tpu.memory_space<vmem>>, vector<32x32xbf16>
    %cst_44 = arith.constant dense<0.000000e+00> : vector<32x32xf32>
    %118 = tpu.matmul %116, %117, %cst_44 {dimension_numbers = #tpu.dot_dimension_numbers<[1], [0], [0], [1], [0, 0, 1, 1], [], []>} : vector<32x32xbf16>, vector<32x32xbf16>, vector<32x32xf32> -> vector<32x32xf32>
    %119 = vector.shape_cast %114 : vector<2x16x32xf32> to vector<32x32xf32>
    %120 = arith.truncf %119 : vector<32x32xf32> to vector<32x32xbf16>
    %c0_45 = arith.constant 0 : index
    %c0_46 = arith.constant 0 : index
    %121 = vector.load %arg14[%c0_45, %c0_46] : memref<32x32xbf16, #tpu.memory_space<vmem>>, vector<32x32xbf16>
    %cst_47 = arith.constant dense<0.000000e+00> : vector<32x32xf32>
    %122 = tpu.matmul %120, %121, %cst_47 {dimension_numbers = #tpu.dot_dimension_numbers<[1], [0], [0], [1], [0, 0, 1, 1], [], []>} : vector<32x32xbf16>, vector<32x32xbf16>, vector<32x32xf32> -> vector<32x32xf32>
    %123 = arith.addf %118, %122 : vector<32x32xf32>
    %c0_48 = arith.constant 0 : index
    %c0_49 = arith.constant 0 : index
    %124 = vector.load %arg15[%c0_48, %c0_49] : memref<1x32xf32, #tpu.memory_space<vmem>>, vector<1x32xf32>
    %125 = vector.broadcast %124 : vector<1x32xf32> to vector<32x32xf32>
    %126 = arith.addf %123, %125 : vector<32x32xf32>
    %cst_50 = arith.constant 0.000000e+00 : f32
    %127 = vector.broadcast %cst_50 : f32 to vector<32x32xf32>
    %128 = arith.maximumf %126, %127 : vector<32x32xf32>
    %129 = vector.shape_cast %128 : vector<32x32xf32> to vector<2x16x32xf32>
    %c0_51 = arith.constant 0 : index
    %c0_52 = arith.constant 0 : index
    %130 = vector.load %arg16[%c0_51, %c0_52] : memref<1x32xf32, #tpu.memory_space<vmem>>, vector<1x32xf32>
    %131 = vector.shape_cast %130 : vector<1x32xf32> to vector<1x1x32xf32>
    %132 = vector.broadcast %131 : vector<1x1x32xf32> to vector<2x16x32xf32>
    %133 = arith.mulf %129, %132 : vector<2x16x32xf32>
    %cst_53 = arith.constant dense<0.000000e+00> : vector<2x16xf32>
    %134 = vector.multi_reduction <add>, %133, %cst_53 [2] : vector<2x16x32xf32> to vector<2x16xf32>
    %c0_54 = arith.constant 0 : index
    %135 = memref.load %arg17[%c0_54] : memref<1xf32, #tpu.memory_space<smem>>
    %136 = vector.broadcast %135 : f32 to vector<2x16xf32>
    %137 = arith.addf %134, %136 : vector<2x16xf32>
    %c0_55 = arith.constant 0 : index
    %c0_56 = arith.constant 0 : index
    %138 = vector.load %arg18[%c0_55, %c0_56] : memref<2x16xf32, #tpu.memory_space<vmem>>, vector<2x16xf32>
    tpu.vector_store %arg18[%c0_55, %c0_56], %137 {strides = array<i32>} : memref<2x16xf32, #tpu.memory_space<vmem>>, vector<2x16xf32>,
    %c0_57 = arith.constant 0 : index
    %c0_58 = arith.constant 0 : index
    %139 = vector.load %arg5[%c0_57, %c0_58] : memref<2x16xf32, #tpu.memory_space<vmem>>, vector<2x16xf32>
    %cst_59 = arith.constant 1.000000e+00 : f32
    %140 = vector.broadcast %cst_59 : f32 to vector<2x16xf32>
    %141 = arith.subf %140, %139 : vector<2x16xf32>
    %cst_60 = arith.constant 1.000000e+09 : f32
    %142 = vector.broadcast %cst_60 : f32 to vector<2x16xf32>
    %143 = arith.mulf %142, %141 : vector<2x16xf32>
    %144 = arith.subf %137, %143 : vector<2x16xf32>
    %cst_61 = arith.constant dense<0xFF800000> : vector<2xf32>
    %145 = vector.multi_reduction <maximumf>, %144, %cst_61 [1] : vector<2x16xf32> to vector<2xf32>
    %146 = vector.shape_cast %145 : vector<2xf32> to vector<2x1xf32>
    %147 = tpu.iota {dimensions = array<i32: 1>} : vector<2x16xi32>
    %148 = vector.broadcast %146 : vector<2x1xf32> to vector<2x16xf32>
    %149 = arith.cmpf oeq, %144, %148 : vector<2x16xf32>
    %c16_i32 = arith.constant 16 : i32
    %150 = vector.broadcast %c16_i32 : i32 to vector<2x16xi32>
    %151 = arith.select %149, %147, %150 : vector<2x16xi1>, vector<2x16xi32>
    %cst_62 = arith.constant dense<2147483647> : vector<2xi32>
    %152 = vector.multi_reduction <minsi>, %151, %cst_62 [1] : vector<2x16xi32> to vector<2xi32>
    %153 = vector.shape_cast %152 : vector<2xi32> to vector<2x1xi32>
    %154 = tpu.iota {dimensions = array<i32: 1>} : vector<2x16x1xi32>
    %155 = vector.shape_cast %153 : vector<2x1xi32> to vector<2x1x1xi32>
    %156 = vector.broadcast %155 : vector<2x1x1xi32> to vector<2x16x1xi32>
    %157 = arith.cmpi eq, %154, %156 : vector<2x16x1xi32>
    %158 = arith.extui %157 : vector<2x16x1xi1> to vector<2x16x1xi32>
    %159 = arith.sitofp %158 : vector<2x16x1xi32> to vector<2x16x1xf32>
    %160 = vector.broadcast %159 : vector<2x16x1xf32> to vector<2x16x32xf32>
    %161 = arith.mulf %160, %81 : vector<2x16x32xf32>
    %cst_63 = arith.constant dense<0.000000e+00> : vector<2x32xf32>
    %162 = vector.multi_reduction <add>, %161, %cst_63 [1] : vector<2x16x32xf32> to vector<2x32xf32>
    %163 = vector.broadcast %159 : vector<2x16x1xf32> to vector<2x16x32xf32>
    %164 = arith.mulf %163, %114 : vector<2x16x32xf32>
    %cst_64 = arith.constant dense<0.000000e+00> : vector<2x32xf32>
    %165 = vector.multi_reduction <add>, %164, %cst_64 [1] : vector<2x16x32xf32> to vector<2x32xf32>
    %166 = tpu.concatenate %162, %165 in 1 : vector<2x32xf32>, vector<2x32xf32> -> vector<2x64xf32>
    %c0_65 = arith.constant 0 : index
    %c0_66 = arith.constant 0 : index
    %167 = vector.load %arg19[%c0_65, %c0_66] : memref<2x64xf32, #tpu.memory_space<vmem>>, vector<2x64xf32>
    tpu.vector_store %arg19[%c0_65, %c0_66], %166 {strides = array<i32>} : memref<2x64xf32, #tpu.memory_space<vmem>>, vector<2x64xf32>,
    return
  }
  func.func @transform_0(%arg0: i32) -> (i32, i32, i32) {
    %c0_i32 = arith.constant 0 : i32
    %c0_i32_0 = arith.constant 0 : i32
    %c0_i32_1 = arith.constant 0 : i32
    return %arg0, %c0_i32, %c0_i32_0 : i32, i32, i32
  }
  func.func @transform_1(%arg0: i32) -> (i32, i32, i32) {
    %c0_i32 = arith.constant 0 : i32
    %c0_i32_0 = arith.constant 0 : i32
    %c0_i32_1 = arith.constant 0 : i32
    return %arg0, %c0_i32, %c0_i32_0 : i32, i32, i32
  }
  func.func @transform_2(%arg0: i32) -> (i32, i32, i32) {
    %c0_i32 = arith.constant 0 : i32
    %c0_i32_0 = arith.constant 0 : i32
    %c0_i32_1 = arith.constant 0 : i32
    return %arg0, %c0_i32, %c0_i32_0 : i32, i32, i32
  }
  func.func @transform_3(%arg0: i32) -> (i32, i32, i32) {
    %c0_i32 = arith.constant 0 : i32
    %c0_i32_0 = arith.constant 0 : i32
    %c0_i32_1 = arith.constant 0 : i32
    return %arg0, %c0_i32, %c0_i32_0 : i32, i32, i32
  }
  func.func @transform_4(%arg0: i32) -> (i32, i32) {
    %c0_i32 = arith.constant 0 : i32
    %c0_i32_0 = arith.constant 0 : i32
    return %arg0, %c0_i32 : i32, i32
  }
  func.func @transform_5(%arg0: i32) -> (i32, i32) {
    %c0_i32 = arith.constant 0 : i32
    %c0_i32_0 = arith.constant 0 : i32
    %c0_i32_1 = arith.constant 0 : i32
    return %c0_i32, %c0_i32_0 : i32, i32
  }
  func.func @transform_6(%arg0: i32) -> (i32, i32) {
    %c0_i32 = arith.constant 0 : i32
    %c0_i32_0 = arith.constant 0 : i32
    %c0_i32_1 = arith.constant 0 : i32
    return %c0_i32, %c0_i32_0 : i32, i32
  }
  func.func @transform_7(%arg0: i32) -> (i32, i32) {
    %c0_i32 = arith.constant 0 : i32
    %c0_i32_0 = arith.constant 0 : i32
    %c0_i32_1 = arith.constant 0 : i32
    return %c0_i32, %c0_i32_0 : i32, i32
  }
  func.func @transform_8(%arg0: i32) -> (i32, i32) {
    %c0_i32 = arith.constant 0 : i32
    %c0_i32_0 = arith.constant 0 : i32
    %c0_i32_1 = arith.constant 0 : i32
    return %c0_i32, %c0_i32_0 : i32, i32
  }
  func.func @transform_9(%arg0: i32) -> (i32, i32) {
    %c0_i32 = arith.constant 0 : i32
    %c0_i32_0 = arith.constant 0 : i32
    %c0_i32_1 = arith.constant 0 : i32
    return %c0_i32, %c0_i32_0 : i32, i32
  }
  func.func @transform_10(%arg0: i32) -> (i32, i32) {
    %c0_i32 = arith.constant 0 : i32
    %c0_i32_0 = arith.constant 0 : i32
    %c0_i32_1 = arith.constant 0 : i32
    return %c0_i32, %c0_i32_0 : i32, i32
  }
  func.func @transform_11(%arg0: i32) -> (i32, i32) {
    %c0_i32 = arith.constant 0 : i32
    %c0_i32_0 = arith.constant 0 : i32
    %c0_i32_1 = arith.constant 0 : i32
    return %c0_i32, %c0_i32_0 : i32, i32
  }
  func.func @transform_12(%arg0: i32) -> (i32, i32) {
    %c0_i32 = arith.constant 0 : i32
    %c0_i32_0 = arith.constant 0 : i32
    %c0_i32_1 = arith.constant 0 : i32
    return %c0_i32, %c0_i32_0 : i32, i32
  }
  func.func @transform_13(%arg0: i32) -> (i32, i32) {
    %c0_i32 = arith.constant 0 : i32
    %c0_i32_0 = arith.constant 0 : i32
    %c0_i32_1 = arith.constant 0 : i32
    return %c0_i32, %c0_i32_0 : i32, i32
  }
  func.func @transform_14(%arg0: i32) -> (i32, i32) {
    %c0_i32 = arith.constant 0 : i32
    %c0_i32_0 = arith.constant 0 : i32
    %c0_i32_1 = arith.constant 0 : i32
    return %c0_i32, %c0_i32_0 : i32, i32
  }
  func.func @transform_15(%arg0: i32) -> (i32, i32) {
    %c0_i32 = arith.constant 0 : i32
    %c0_i32_0 = arith.constant 0 : i32
    %c0_i32_1 = arith.constant 0 : i32
    return %c0_i32, %c0_i32_0 : i32, i32
  }
  func.func @transform_16(%arg0: i32) -> i32 {
    %c0_i32 = arith.constant 0 : i32
    %c0_i32_0 = arith.constant 0 : i32
    return %c0_i32 : i32
  }
  func.func @transform_17(%arg0: i32) -> (i32, i32) {
    %c0_i32 = arith.constant 0 : i32
    %c0_i32_0 = arith.constant 0 : i32
    return %arg0, %c0_i32 : i32, i32
  }
  func.func @transform_18(%arg0: i32) -> (i32, i32) {
    %c0_i32 = arith.constant 0 : i32
    %c0_i32_0 = arith.constant 0 : i32
    return %arg0, %c0_i32 : i32, i32
  }
}

</mosaic_0001>

<bundles_post_ra>
// kernel: tpu_custom_call.1
= control target key start
LH: loop header
LB: loop body
LE: loop exit
PB: predicated region body
PF: predicated region fallthrough
CT: control target
= control target key end

     0   :  { %s2079_s0 = inlined_call_operand.hbm [shape: f32[2,4,32], index: 0, kind: input, shape index: {}]   ;;  %s2080_s1 = inlined_call_operand.hbm [shape: f32[2,4,32], index: 1, kind: input, shape index: {}]   ;;  %s2081_s2 = inlined_call_operand.hbm [shape: f32[2,4,32], index: 2, kind: input, shape index: {}]   ;;  %s2082_s3 = inlined_call_operand.vmem [shape: f32[2,4,1], index: 3, kind: input, shape index: {}]   ;;  %s2083_s4 = inlined_call_operand.hbm [shape: f32[2,16], index: 4, kind: input, shape index: {}]   ;;  %s2084_s5 = inlined_call_operand.hbm [shape: f32[6,32], index: 5, kind: input, shape index: {}]   ;;  %s2085_s6 = inlined_call_operand.vmem [shape: bf16[32,32], index: 6, kind: input, shape index: {}]   ;;  %s2086_s7 = inlined_call_operand.hbm [shape: f32[1,32], index: 7, kind: input, shape index: {}]   ;;  %s2087_s8 = inlined_call_operand.hbm [shape: bf16[32,32], index: 8, kind: input, shape index: {}]   ;;  %s2088_s9 = inlined_call_operand.hbm [shape: f32[1,32], index: 9, kind: input, shape index: {}]   ;;  %s2089_s10 = inlined_call_operand.hbm [shape: bf16[32,32], index: 10, kind: input, shape index: {}]   ;;  %s2090_s11 = inlined_call_operand.hbm [shape: f32[1,32], index: 11, kind: input, shape index: {}]   ;;  %s2091_s12 = inlined_call_operand.vmem [shape: bf16[32,32], index: 12, kind: input, shape index: {}]   ;;  %s2092_s13 = inlined_call_operand.hbm [shape: bf16[32,32], index: 13, kind: input, shape index: {}]   ;;  %s2093_s14 = inlined_call_operand.vmem [shape: f32[1,32], index: 14, kind: input, shape index: {}]   ;;  %s2094_s15 = inlined_call_operand.vmem [shape: f32[1,32], index: 15, kind: input, shape index: {}]   ;;  %s2095_s16 = inlined_call_operand.<no memory space> [shape: f32[1], index: 16, kind: input, shape index: {}]   ;;  %s2096_s17 = inlined_call_operand.hbm [shape: f32[2,16], index: 17, kind: output, shape index: {0}]   ;;  %s2097_s18 = inlined_call_operand.hbm [shape: f32[2,64], index: 18, kind: output, shape index: {1}]  }
   0x1   :  { %2098 = sst [smem:[#allocation32_spill]] %s2079_s0 }
   0x2   :  { %2099 = sst [smem:[#allocation33_spill]] %s2080_s1 }
   0x3   :  { %2100 = sst [smem:[#allocation34_spill]] %s2081_s2 }
   0x4   :  { %25 = vsyncpa [#allocation4], 0 }
   0x5   :  { %26 = vsyncpa [#allocation7], 0 }
   0x6   :  { %27 = vsyncpa [#allocation10], 0 }
   0x7   :  { %28 = vsyncpa [#allocation13], 0 }
   0x8   :  { %29 = vsyncpa [#allocation16], 0 }
   0x9   :  { %30 = vsyncpa [#allocation19], 0 }
   0xa   :  { %31 = vsyncpa [#allocation5], 0 }
   0xb   :  { %32 = vsyncpa [#allocation23], 0  ;;  %s1633_s27 = smov [#allocation6]   ;;  %s1634_s29 = smov [#allocation9]  }
   0xc   :  { %s50_s28 = sshll.u32 %s1633_s27, 4  ;;  %s77_s30 = sshll.u32 %s1634_s29, 4  ;;  %s51_s28 = int_to_ptr.vmem [resolvable:$true] %s50_s28  ;;  %s78_s30 = int_to_ptr.vmem [resolvable:$true] %s77_s30 }
   0xd   :  { %s1365_s0 = scalar_lea.vmem %s51_s28, 128  ;;  %p1370_p1 = scmp.lt.s32.totalorder %s51_s28, %s51_s28 }
   0xe   :  { %p1366_p0 = scmp.ne.s32.totalorder %s51_s28, %s1365_s0  ;;  %p1371_p2 = scmp.lt.s32.totalorder %s1365_s0, %s1365_s0 }
  0x10   :  { %p1372_p3 = por %p1371_p2, %p1370_p1 }
  0x12   :  { %p1373_p4 = pnand %p1372_p3, %p1366_p0 }
  0x14   :  { %1376 = shalt.err (!%p1373_p4)
}
  0x15   :  { %s1635_s19 = smov 64   ;;  %s1636_s1 = smov 4  }
  0x16   :  { %s2101_s22 = sld [smem:[#allocation33_spill]]  ;;  %s1385_s2 = scalar_lea.vmem %s78_s30, 32 }
  0x17   :  { %p1386_p5 = scmp.ne.s32.totalorder %s78_s30, %s1385_s2  ;;  %p1390_p6 = scmp.lt.s32.totalorder %s78_s30, %s78_s30 }
  0x18   :  { %p1391_p7 = scmp.lt.s32.totalorder %s1385_s2, %s1385_s2 }
  0x1a   :  { %p1392_p8 = por %p1391_p7, %p1390_p6 }
  0x1c   :  { %56 = dma.hbm_to_vmem [thread:$0]  %s2101_s22, 128, %s51_s28, [#allocation7], %s1635_s19, %s1635_s19, %s1636_s1  }
  0x1d   :  { %p1393_p9 = pnand %p1392_p8, %p1386_p5 }
  0x1f   :  { %1396 = shalt.err (!%p1393_p9)
}
  0x20   :  { %80 = dma.hbm_to_vmem [thread:$0]  %s2083_s4, 32, %s78_s30, [#allocation10]  }
  0x21   :  { %s1637_s25 = smov [#allocation12]   ;;  %s1638_s27 = smov [#allocation15]  }
  0x22   :  { %s99_s26 = sshll.u32 %s1637_s25, 4  ;;  %s121_s29 = sshll.u32 %s1638_s27, 4  ;;  %s100_s26 = int_to_ptr.vmem [resolvable:$true] %s99_s26  ;;  %s122_s29 = int_to_ptr.vmem [resolvable:$true] %s121_s29 }
  0x23   :  { %s1405_s0 = scalar_lea.vmem %s100_s26, 16  ;;  %s1409_s28 = scalar_lea.vmem %s100_s26, 32 }
  0x24   :  { %p1406_p10 = scmp.ne.s32.totalorder %s100_s26, %s1405_s0  ;;  %p1410_p11 = scmp.lt.s32.totalorder %s100_s26, %s100_s26 }
  0x25   :  { %p1411_p12 = scmp.lt.s32.totalorder %s1409_s28, %s1405_s0 }
  0x27   :  { %p1412_p13 = por %p1411_p12, %p1410_p11 }
  0x29   :  { %p1413_p0 = pnand %p1412_p13, %p1406_p10 }
  0x2b   :  { %1416 = shalt.err (!%p1413_p0)
}
  0x2c   :  { %102 = dma.hbm_to_vmem [thread:$0]  %s2086_s7, 16, %s100_s26, [#allocation13]  }
  0x2d   :  { %s1425_s22 = scalar_lea.vmem %s122_s29, 16  ;;  %s1429_s4 = scalar_lea.vmem %s122_s29, 32 }
  0x2e   :  { %p1426_p1 = scmp.ne.s32.totalorder %s122_s29, %s1425_s22  ;;  %p1430_p2 = scmp.lt.s32.totalorder %s122_s29, %s122_s29 }
  0x2f   :  { %p1431_p3 = scmp.lt.s32.totalorder %s1429_s4, %s1425_s22 }
  0x31   :  { %p1432_p4 = por %p1431_p3, %p1430_p2 }
  0x33   :  { %p1433_p5 = pnand %p1432_p4, %p1426_p1 }
  0x35   :  { %1436 = shalt.err (!%p1433_p5)
}
  0x36   :  { %124 = dma.hbm_to_vmem [thread:$0]  %s2088_s9, 16, %s122_s29, [#allocation16]  }
  0x37   :  { %s1639_s23 = smov [#allocation18]   ;;  %s1640_s25 = smov [#allocation3]  }
  0x38   :  { %s143_s24 = sshll.u32 %s1639_s23, 4  ;;  %s38_s27 = sshll.u32 %s1640_s25, 4  ;;  %s144_s24 = int_to_ptr.vmem [resolvable:$true] %s143_s24  ;;  %s39_s27 = int_to_ptr.vmem [resolvable:$true] %s38_s27 }
  0x39   :  { %s1445_s0 = scalar_lea.vmem %s144_s24, 16  ;;  %s1449_s7 = scalar_lea.vmem %s144_s24, 32 }
  0x3a   :  { %p1446_p6 = scmp.ne.s32.totalorder %s144_s24, %s1445_s0  ;;  %p1450_p7 = scmp.lt.s32.totalorder %s144_s24, %s144_s24 }
  0x3b   :  { %p1451_p8 = scmp.lt.s32.totalorder %s1449_s7, %s1445_s0 }
  0x3d   :  { %p1452_p9 = por %p1451_p8, %p1450_p7 }
  0x3f   :  { %p1453_p10 = pnand %p1452_p9, %p1446_p6 }
  0x41   :  { %1456 = shalt.err (!%p1453_p10)
}
  0x42   :  { %146 = dma.hbm_to_vmem [thread:$0]  %s2090_s11, 16, %s144_s24, [#allocation19]  }
  0x43   :  { %s1465_s20 = scalar_lea.vmem %s39_s27, 128  ;;  %p1470_p12 = scmp.lt.s32.totalorder %s39_s27, %s39_s27 }
  0x44   :  { %p1466_p11 = scmp.ne.s32.totalorder %s39_s27, %s1465_s20  ;;  %p1471_p13 = scmp.lt.s32.totalorder %s1465_s20, %s1465_s20 }
  0x46   :  { %p1472_p0 = por %p1471_p13, %p1470_p12 }
  0x48   :  { %p1473_p1 = pnand %p1472_p0, %p1466_p11 }
  0x4a   :  { %1476 = shalt.err (!%p1473_p1)
}
  0x4b   :  { %s2102_s21 = sld [smem:[#allocation32_spill]]  ;;  %s1641_s22 = smov [#allocation8]  }
  0x4c   :  { %s62_s4 = sshll.u32 %s1641_s22, 4  ;;  %s1642_s30 = smov [#allocation11]   ;;  %s63_s4 = int_to_ptr.vmem [resolvable:$true] %s62_s4 }
  0x4d   :  { %s87_s2 = sshll.u32 %s1642_s30, 4  ;;  %s1485_s11 = scalar_lea.vmem %s63_s4, 128  ;;  %s88_s2 = int_to_ptr.vmem [resolvable:$true] %s87_s2 }
  0x4e   :  { %p1486_p2 = scmp.ne.s32.totalorder %s63_s4, %s1485_s11  ;;  %p1490_p3 = scmp.lt.s32.totalorder %s63_s4, %s63_s4 }
  0x4f   :  { %p1491_p4 = scmp.lt.s32.totalorder %s1485_s11, %s1485_s11 }
  0x51   :  { %44 = dma.hbm_to_vmem [thread:$0]  %s2102_s21, 128, %s39_s27, [#allocation4], %s1635_s19, %s1635_s19, %s1636_s1  }
  0x52   :  { %p1492_p5 = por %p1491_p4, %p1490_p3 }
  0x54   :  { %p1493_p6 = pnand %p1492_p5, %p1486_p2 }
  0x56   :  { %1496 = shalt.err (!%p1493_p6)
}
  0x57   :  { %s2103_s25 = sld [smem:[#allocation34_spill]]  ;;  %s1505_s27 = scalar_lea.vmem %s88_s2, 128 }
  0x58   :  { %p1506_p7 = scmp.ne.s32.totalorder %s88_s2, %s1505_s27  ;;  %p1510_p8 = scmp.lt.s32.totalorder %s88_s2, %s88_s2 }
  0x59   :  { %p1511_p9 = scmp.lt.s32.totalorder %s1505_s27, %s1505_s27 }
  0x5b   :  { %p1512_p10 = por %p1511_p9, %p1510_p8 }
  0x5d   :  { %68 = dma.hbm_to_vmem [thread:$0]  %s2103_s25, 128, %s63_s4, [#allocation7], %s1635_s19, %s1635_s19, %s1636_s1  }
  0x5e   :  { %p1513_p11 = pnand %p1512_p10, %p1506_p7 }
  0x60   :  { %1516 = shalt.err (!%p1513_p11)
}
  0x61   :  { %90 = dma.hbm_to_vmem [thread:$0]  %s2084_s5, 128, %s88_s2, [#allocation10]  }
  0x62   :  { %s1643_s26 = smov [#allocation14]   ;;  %s1644_s20 = smov [#allocation17]  }
  0x63   :  { %s108_s28 = sshll.u32 %s1643_s26, 4  ;;  %s130_s9 = sshll.u32 %s1644_s20, 4  ;;  %s109_s28 = int_to_ptr.vmem [resolvable:$true] %s108_s28  ;;  %s131_s9 = int_to_ptr.vmem [resolvable:$true] %s130_s9 }
  0x64   :  { %s1525_s29 = scalar_lea.vmem %s109_s28, 256  ;;  %p1530_p13 = scmp.lt.s32.totalorder %s109_s28, %s109_s28 }
  0x65   :  { %p1526_p12 = scmp.ne.s32.totalorder %s109_s28, %s1525_s29  ;;  %p1531_p0 = scmp.lt.s32.totalorder %s1525_s29, %s1525_s29 }
  0x67   :  { %p1532_p1 = por %p1531_p0, %p1530_p13 }
  0x69   :  { %p1533_p2 = pnand %p1532_p1, %p1526_p12 }
  0x6b   :  { %1536 = shalt.err (!%p1533_p2)
}
  0x6c   :  { %114 = dma.hbm_to_vmem [thread:$0]  %s2087_s8, 256, %s109_s28, [#allocation13], %s1635_s19, %s1635_s19, %s1636_s1  }
  0x6d   :  { %s1545_s5 = scalar_lea.vmem %s131_s9, 256  ;;  %p1550_p4 = scmp.lt.s32.totalorder %s131_s9, %s131_s9 }
  0x6e   :  { %p1546_p3 = scmp.ne.s32.totalorder %s131_s9, %s1545_s5  ;;  %p1551_p5 = scmp.lt.s32.totalorder %s1545_s5, %s1545_s5 }
  0x70   :  { %p1552_p6 = por %p1551_p5, %p1550_p4 }
  0x72   :  { %p1553_p7 = pnand %p1552_p6, %p1546_p3 }
  0x74   :  { %1556 = shalt.err (!%p1553_p7)
}
  0x75   :  { %136 = dma.hbm_to_vmem [thread:$0]  %s2089_s10, 256, %s131_s9, [#allocation16], %s1635_s19, %s1635_s19, %s1636_s1  }
  0x76   :  { %s1645_s2 = smov [#allocation20]  }
  0x77   :  { %s154_s11 = sshll.u32 %s1645_s2, 4  ;;  %s155_s11 = int_to_ptr.vmem [resolvable:$true] %s154_s11 }
  0x78   :  { %s1565_s23 = scalar_lea.vmem %s155_s11, 256  ;;  %p1570_p9 = scmp.lt.s32.totalorder %s155_s11, %s155_s11 }
  0x79   :  { %p1566_p8 = scmp.ne.s32.totalorder %s155_s11, %s1565_s23  ;;  %p1571_p10 = scmp.lt.s32.totalorder %s1565_s23, %s1565_s23 }
  0x7b   :  { %p1572_p11 = por %p1571_p10, %p1570_p9 }
  0x7d   :  { %p1573_p12 = pnand %p1572_p11, %p1566_p8 }
  0x7f   :  { %1576 = shalt.err (!%p1573_p12)
}
  0x80   :  { %160 = dma.hbm_to_vmem [thread:$0]  %s2092_s13, 256, %s155_s11, [#allocation19], %s1635_s19, %s1635_s19, %s1636_s1  }
  0x81   :  { %1617 = dma.done.wait [#allocation4], 128  }
  0x82   :  { %1618 = vsyncadd [#allocation4], 4294967168 }
  0x83   :  { %1619 = dma.done.wait [#allocation7], 256  }
  0x84   :  { %1620 = vsyncadd [#allocation7], 4294967040 }
  0x85   :  { %1621 = dma.done.wait [#allocation10], 160  }
  0x86   :  { %1622 = vsyncadd [#allocation10], 4294967136 }
  0x87   :  { %1623 = dma.done.wait [#allocation13], 272  }
  0x88   :  { %1624 = vsyncadd [#allocation13], 4294967024 }
  0x89   :  { %1625 = dma.done.wait [#allocation16], 272  }
  0x8a   :  { %1626 = vsyncadd [#allocation16], 4294967024 }
  0x8b   :  { %1627 = dma.done.wait [#allocation19], 272  }
  0x8c   :  { %1628 = vsyncadd [#allocation19], 4294967024  ;;  %v210_v0 = vlaneseq  ;;  %v1347_v2 = vld [vmem:[%s2085_s6 + $0x8] sm:$0xff]   ;;  %v1348_v4 = vld [vmem:[%s2085_s6] sm:$0xff]   ;;  %vm236_vm1 = vcmask 1045504   ;;  %v1646_v7 = vmov 0.0  }
  0x8d   :  { %1271 = vmatprep.subr.bf16.mxu0 %v1347_v2  ;;  %v205_v5 = vld [vmem:[#allocation8] sm:$0xf]  ;;  %v206_v6 = vld [vmem:[#allocation8 + $0x4] sm:$0xf]  ;;  %vm239_vm2 = vcmask 1041408   ;;  %vm256_vm3 = vcmask 1043456  }
  0x8e   :  { %v1798_v1 = vshrl.u32 %v210_v0, 7  ;;  %1272 = vmatpush3.bf16.msra.mxu0 %v1347_v2  ;;  %v201_v9 = vld [vmem:[#allocation3] sm:$0xf]  ;;  %v203_v10 = vld [vmem:[#allocation6] sm:$0xf]  ;;  %vm288_vm4 = vcmask 261120  }
  0x8f   :  { %1273 = vmatprep.subr.bf16.mxu0 %v1348_v4  ;;  %v1349_v13 = vld [vmem:[#allocation17 + $0x8] sm:$0xff]   ;;  %v204_v14 = vld [vmem:[#allocation6 + $0x4] sm:$0xf]  ;;  %v254_v19 = vadd.f32 %v205_v5, %v201_v9  ;;  %v257_v26 = vsel %vm256_vm3, %v201_v9, 0.0  ;;  %v1350_v44 = vld [vmem:[#allocation17] sm:$0xff]   ;;  %v1647_v49 = vmov 0  }
  0x90   :  { %vm212_vm0 = vcmp.eq.s32.totalorder %v1798_v1, 1  ;;  %v1805_v3 = vsub.s32 1, %v1798_v1  ;;  %v202_v17 = vld [vmem:[#allocation3 + $0x4] sm:$0xf]  ;;  %v209_v18 = vld [vmem:[#allocation11] sm:$0x3f]  ;;  %1345 = vset.pattern.permute.xlu0 %v1647_v49  ;;  %1346 = vset.pattern.permute.xlu1 %v1647_v49 }
  0x91   :  { %v1811_v8 = vsel %vm212_vm0, 1.0, %v1646_v7  ;;  %v259_v27 = vsel %vm256_vm3, %v254_v19, 0.0  ;;  %v255_v39 = vadd.f32 %v206_v6, %v202_v17  ;;  %v258_v40 = vsel %vm256_vm3, %v202_v17, 0.0  ;;  %v1351_v43 = vld [vmem:[#allocation14 + $0x8] sm:$0xff]   ;;  %v1352_v45 = vld [vmem:[#allocation14] sm:$0xff]  }
  0x92   :  { %v221_v11 = vrot.slane %v205_v5, %v1805_v3  ;;  %v225_v12 = vrot.slane %v206_v6, %v1805_v3  ;;  %1274 = vmatpush3.bf16.msra.mxu0 %v1348_v4  ;;  %v245_v22 = vrot.slane %v201_v9, %v1805_v3  ;;  %v249_v23 = vrot.slane %v202_v17, %v1805_v3  ;;  %v207_v46 = vld [vmem:[%s2082_s3] sm:$0xf]  ;;  %v208_v48 = vld [vmem:[%s2082_s3 + $0x4] sm:$0xf] }
  0x93   :  { %1295 = vmatprep.subr.bf16.mxu0 %v1349_v13  ;;  %v262_v36 = vpack.c.bf16 %v259_v27, %v257_v26  ;;  %v260_v41 = vsel %vm256_vm3, %v255_v39, 0.0  ;;  %1283 = vmatprep.subr.bf16.mxu1 %v1351_v43  ;;  %v215_v47 = vsub.f32 1.0, %v1811_v8  ;;  %v629_v50 = vrot.slane %v207_v46, 1  ;;  %v1208_v56 = vld [vmem:[#allocation12] ss:$0 sm:$0xff] }
  0x94   :  { %v226_v15 = vmul.f32 %v1811_v8, %v221_v11  ;;  %v227_v16 = vmul.f32 %v1811_v8, %v225_v12  ;;  %v264_v42 = vpack.c.bf16 %v260_v41, %v258_v40  ;;  %1284 = vmatpush3.bf16.msra.mxu1 %v1351_v43  ;;  %v630_v51 = vrot.slane %v208_v48, 1  ;;  %v950_v26 = vld [vmem:[#allocation9] sm:$0x3] }
  0x95   :  { %1285 = vmatprep.subr.bf16.mxu1 %v1352_v45  ;;  %v216_v52 = vmul.f32 %v215_v47, %v207_v46  ;;  %1323 = vpush %v629_v50  ;;  %v217_v53 = vmul.f32 %v215_v47, %v208_v48  ;;  %v951_v27 = vsub.f32 1.0, %v950_v26  ;;  %vm594_vm5 = vcmask 257024  }
  0x96   :  { %v228_v20 = vadd.f32 %v226_v15, %v203_v10  ;;  %v229_v21 = vadd.f32 %v227_v16, %v204_v14  ;;  %1325 = vpush %v630_v51  ;;  %vm934_vm10 = vcmask 130112   ;;  %vm945_vm11 = vcmask 1041409  }
  0x97   :  { %584 = vperm.xlu0 %1345, %v216_v52   ;;  %vm948_vm12 = vcmask 123904  }
  0x98   :  { %v232_v24 = vrot.slane %v228_v20, 2  ;;  %v233_v25 = vrot.slane %v229_v21, 2  ;;  %1286 = vmatpush3.bf16.msra.mxu1 %v1352_v45 }
  0x9a   :  { %v237_v28 = vsel %vm236_vm1, %v209_v18, %v232_v24  ;;  %v238_v29 = vsel %vm236_vm1, %v209_v18, %v233_v25  ;;  %v240_v30 = vsel %vm239_vm2, %v232_v24, 0.0  ;;  %v241_v31 = vsel %vm239_vm2, %v233_v25, 0.0  ;;  %v1354_v24 = vld [vmem:[#allocation20] sm:$0xff]  }
  0x9b   :  { %v250_v32 = vadd.f32 %v245_v22, %v237_v28  ;;  %v251_v33 = vadd.f32 %v245_v22, %v240_v30  ;;  %v252_v34 = vadd.f32 %v249_v23, %v238_v29  ;;  %v253_v35 = vadd.f32 %v249_v23, %v241_v31  ;;  %589 = vperm.xlu0 %1345, %v217_v53   ;;  %v1353_v23 = vld [vmem:[#allocation20 + $0x8] sm:$0xff]   ;;  %v1849_v25 = vld [vmem:[%s2091_s12 + $0x8] sm:$0xff]  }
  0x9c   :  { %1307 = vmatprep.subr.bf16.mxu1 %v1353_v23  ;;  %v1853_v28 = vsub.s32 0, %v1798_v1  ;;  %v952_v29 = vmul.f32 1e+09, %v951_v27 }
  0x9d   :  { %v261_v37 = vpack.c.bf16 %v251_v33, %v250_v32  ;;  %v263_v38 = vpack.c.bf16 %v253_v35, %v252_v34  ;;  %v1860_v32 = vld [vmem:[#allocation18] ss:$0 sm:$0xff]  ;;  %v1862_v34 = vld [vmem:[#allocation15] ss:$0 sm:$0xff] }
  0x9e   :  { %v957_v30 = vrot.slane %v952_v29, %v1853_v28  ;;  %v1857_v31 = vrot.slane %v952_v29, %v1805_v3 }
  0x9f   :  { %1275 = vmatprep.mubr.msk.bf16.mxu0 %vm288_vm4, %v261_v37 }
  0xa0   :  { %1276 = vmatmul.mubr.msk.bf16.vlgmr.msra.gmra.mxu0 %vm288_vm4, %v262_v36  ;;  %959 = vbcast.lane.b32.xlu1 %v957_v30, 256 }
  0xa1   :  { %1279 = vmatprep.mubr.msk.bf16.mxu0 %vm288_vm4, %v263_v38  ;;  %1296 = vmatpush3.bf16.msra.mxu0 %v1349_v13 }
  0xa2   :  { %1297 = vmatprep.subr.bf16.mxu0 %v1350_v44 }
  0xa4   :  { %963 = vbcast.lane.b32.xlu1 %v957_v30, 264 }
  0xa5   :  { %1298 = vmatpush3.bf16.msra.mxu0 %v1350_v44 }
  0xa8   :  { %1280 = vmatmul.mubr.msk.bf16.gmra.mxu0 %vm288_vm4, %v264_v42  ;;  %970 = vbcast.lane.b32.xlu1 %v1857_v31, 256 }
  0xc6   :  { %s1324_s26 = spop %1323 }
  0xc7   :  { %s1326_s28 = spop %1325 }
 0x112   :  { %v1865_v37 = vpop.permute.xlu0 %584 }
 0x160   :  { %v1277_v54 = vpop.f32.mrf.mxu0 }
 0x161   :  { %v344_v60 = vadd.f32 %v1277_v54, %v1208_v56 }
 0x162   :  { %v335_v55 = vpop.f32.mrf.mxu0 }
 0x163   :  { %v336_v58 = vadd.f32 %v1208_v56, %v335_v55  ;;  %v368_v6 = vmax.f32 %v344_v60, 0.0 }
 0x164   :  { %v1278_v57 = vpop.f32.mrf.mxu0 }
 0x165   :  { %v347_v59 = vadd.f32 %v1278_v57, %v1208_v56  ;;  %v366_v4 = vmax.f32 %v336_v58, 0.0  ;;  %v1880_v58 = vpop.permute.xlu0 %589 }
 0x166   :  { %v338_v61 = vpop.f32.mrf.mxu0 }
 0x167   :  { %v339_v62 = vadd.f32 %v1208_v56, %v338_v61  ;;  %v369_v63 = vmax.f32 %v347_v59, 0.0 }
 0x168   :  { %v1281_v2 = vpop.f32.mrf.mxu0 }
 0x169   :  { %v367_v5 = vmax.f32 %v339_v62, 0.0  ;;  %v375_v10 = vpack.c.bf16 %v369_v63, %v368_v6  ;;  %v360_v14 = vadd.f32 %v1281_v2, %v1208_v56 }
 0x16a   :  { %v351_v8 = vpop.f32.mrf.mxu0 }
 0x16b   :  { %v374_v9 = vpack.c.bf16 %v367_v5, %v366_v4  ;;  %v352_v12 = vadd.f32 %v1208_v56, %v351_v8  ;;  %v372_v20 = vmax.f32 %v360_v14, 0.0 }
 0x16c   :  { %v1282_v11 = vpop.f32.mrf.mxu0 }
 0x16d   :  { %v363_v13 = vadd.f32 %v1282_v11, %v1208_v56  ;;  %1287 = vmatprep.mubr.msk.bf16.mxu1 %vm288_vm4, %v374_v9  ;;  %1299 = vmatprep.mubr.msk.bf16.mxu0 %vm288_vm4, %v374_v9  ;;  %v370_v18 = vmax.f32 %v352_v12, 0.0 }
 0x16e   :  { %v354_v15 = vpop.f32.mrf.mxu0  ;;  %1288 = vmatmul.mubr.msk.bf16.vlgmr.msra.gmra.mxu1 %vm288_vm4, %v375_v10  ;;  %1300 = vmatmul.mubr.msk.bf16.vlgmr.msra.gmra.mxu0 %vm288_vm4, %v375_v10 }
 0x16f   :  { %v355_v16 = vadd.f32 %v1208_v56, %v354_v15  ;;  %v373_v17 = vmax.f32 %v363_v13, 0.0  ;;  %1308 = vmatpush3.bf16.msra.mxu1 %v1353_v23 }
 0x170   :  { %1309 = vmatprep.subr.bf16.mxu1 %v1354_v24 }
 0x171   :  { %v371_v19 = vmax.f32 %v355_v16, 0.0  ;;  %v377_v22 = vpack.c.bf16 %v373_v17, %v372_v20 }
 0x173   :  { %v376_v21 = vpack.c.bf16 %v371_v19, %v370_v18  ;;  %1310 = vmatpush3.bf16.msra.mxu1 %v1354_v24 }
 0x174   :  { %1315 = vmatprep.subr.bf16.mxu1 %v1849_v25 }
 0x175   :  { %1291 = vmatprep.mubr.msk.bf16.mxu1 %vm288_vm4, %v376_v21  ;;  %1303 = vmatprep.mubr.msk.bf16.mxu0 %vm288_vm4, %v376_v21 }
 0x176   :  { %1292 = vmatmul.mubr.msk.bf16.gmra.mxu1 %vm288_vm4, %v377_v22  ;;  %1304 = vmatmul.mubr.msk.bf16.gmra.mxu0 %vm288_vm4, %v377_v22 }
 0x22e   :  { %v1289_v33 = vpop.f32.mrf.mxu1  ;;  %v1301_v35 = vpop.f32.mrf.mxu0 }
 0x22f   :  { %v552_v36 = vadd.f32 %v1301_v35, %v1860_v32  ;;  %v456_v40 = vadd.f32 %v1289_v33, %v1862_v34 }
 0x230   :  { %v447_v38 = vpop.f32.mrf.mxu1  ;;  %v543_v39 = vpop.f32.mrf.mxu0 }
 0x231   :  { %v576_v41 = vmax.f32 %v552_v36, 0.0  ;;  %v480_v47 = vmax.f32 %v456_v40, 0.0  ;;  %v448_v20 = vadd.f32 %v1862_v34, %v447_v38  ;;  %v544_v24 = vadd.f32 %v1860_v32, %v543_v39 }
 0x232   :  { %v1290_v42 = vpop.f32.mrf.mxu1  ;;  %v1302_v43 = vpop.f32.mrf.mxu0  ;;  %v1912_v40 = vstv %s1324_s26 }
 0x233   :  { %v1869_v44 = vmul.f32 %v1865_v37, %v576_v41  ;;  %v592_v55 = vmul.f32 %v1865_v37, %v480_v47  ;;  %v459_v4 = vadd.f32 %v1290_v42, %v1862_v34  ;;  %v478_v41 = vmax.f32 %v448_v20, 0.0 }
 0x234   :  { %v1871_v45 = vpop.f32.mrf.mxu1  ;;  %v546_v46 = vpop.f32.mrf.mxu0  ;;  %v574_v38 = vmax.f32 %v544_v24, 0.0 }
 0x235   :  { %v651_v48 = vsel %vm594_vm5, %v1869_v44, -inf  ;;  %v595_v62 = vsel %vm594_vm5, %v592_v55, 0.0  ;;  %v481_v11 = vmax.f32 %v459_v4, 0.0 }
 0x236   :  { %v652_v49 = vrot.slane %v651_v48, 4  ;;  %v1293_v50 = vpop.f32.mrf.mxu1  ;;  %v1305_v51 = vpop.f32.mrf.mxu0  ;;  %v596_v6 = vrot.slane %v595_v62, 4 }
 0x237   :  { %v568_v52 = vadd.f32 %v1305_v51, %v1860_v32  ;;  %v1877_v54 = vadd.f32 %v1293_v50, %v1862_v34  ;;  %v609_v36 = vsub.f32 %v481_v11, %v480_v47  ;;  %v555_v50 = vadd.f32 %v1302_v43, %v1860_v32 }
 0x238   :  { %v653_v53 = vmax.f32 %v651_v48, %v652_v49  ;;  %v1905_v15 = vpop.f32.mrf.mxu1  ;;  %v597_v16 = vadd.f32 %v596_v6, %v595_v62  ;;  %v547_v51 = vadd.f32 %v1860_v32, %v546_v46  ;;  %v559_v46 = vpop.f32.mrf.mxu0 }
 0x239   :  { %v580_v56 = vmax.f32 %v568_v52, 0.0  ;;  %v484_v61 = vmax.f32 %v1877_v54, 0.0  ;;  %v577_v4 = vmax.f32 %v555_v50, 0.0 }
 0x23a   :  { %v654_v57 = vrot.slane %v653_v53, 2  ;;  %v1294_v33 = vpop.f32.mrf.mxu1  ;;  %v598_v35 = vrot.slane %v597_v16, 2 }
 0x23b   :  { %v1883_v59 = vmul.f32 %v1880_v58, %v580_v56  ;;  %v593_v9 = vmul.f32 %v1880_v58, %v484_v61  ;;  %v475_v39 = vadd.f32 %v1294_v33, %v1862_v34  ;;  %v611_v56 = vmul.f32 %v609_v36, %v1865_v37 }
 0x23c   :  { %v655_v60 = vmax.f32 %v653_v53, %v654_v57  ;;  %v599_v47 = vadd.f32 %v598_v35, %v597_v16  ;;  %v451_v16 = vadd.f32 %v1862_v34, %v1871_v45  ;;  %v707_v24 = vmul.f32 %v1865_v37, %v577_v4 }
 0x23d   :  { %v658_v63 = vsel %vm594_vm5, %v1883_v59, -inf  ;;  %v602_v19 = vsel %vm594_vm5, %v593_v9, 0.0  ;;  %v615_v20 = vrot.slane %v611_v56, 2  ;;  %v466_v56 = vpop.f32.mrf.mxu1 }
 0x23e   :  { %v656_v2 = vrot.slane %v655_v60, 1  ;;  %v659_v5 = vrot.slane %v658_v63, 4  ;;  %v603_v29 = vrot.slane %v602_v19, 4  ;;  %v479_v36 = vmax.f32 %v451_v16, 0.0 }
 0x23f   :  { %v619_v37 = vsel %vm236_vm1, 0.0, %v615_v20 }
 0x240   :  { %v1890_v8 = vmax.f32 %v655_v60, %v656_v2  ;;  %v660_v10 = vmax.f32 %v658_v63, %v659_v5  ;;  %v604_v55 = vadd.f32 %v603_v29, %v602_v19  ;;  %v1933_v5 = vmul.f32 %v1912_v40, %v478_v41  ;;  %v1306_v19 = vpop.f32.mrf.mxu0 }
 0x241   :  { %v571_v33 = vadd.f32 %v1306_v19, %v1860_v32 }
 0x242   :  { %vm665_vm6 = vcmp.eq.f32.partialorder %v1869_v44, %v1890_v8  ;;  %v661_v14 = vrot.slane %v660_v10, 2 }
 0x243   :  { %v1229_v12 = vsel %vm665_vm6, 1.0, %v1646_v7  ;;  %v685_v13 = vsel %vm665_vm6, 0.0, %v1869_v44  ;;  %v621_v44 = vsel %vm239_vm2, %v615_v20, 0.0 }
 0x244   :  { %v671_v17 = vsel %vm594_vm5, %v1229_v12, 0.0  ;;  %v687_v18 = vsel %vm594_vm5, %v685_v13, -inf  ;;  %v662_v23 = vmax.f32 %v660_v10, %v661_v14  ;;  %v605_v12 = vrot.slane %v604_v55, 2 }
 0x245   :  { %v672_v21 = vrot.slane %v671_v17, 4  ;;  %v688_v22 = vrot.slane %v687_v18, 4  ;;  %v485_v13 = vmax.f32 %v475_v39, 0.0  ;;  %v721_v14 = vmul.f32 %v1912_v40, %v574_v38 }
 0x246   :  { %v663_v30 = vrot.slane %v662_v23, 1 }
 0x247   :  { %v673_v26 = vadd.f32 %v672_v21, %v671_v17  ;;  %v689_v27 = vmax.f32 %v687_v18, %v688_v22  ;;  %v600_v21 = vrot.slane %v599_v47, 1  ;;  %v575_v22 = vmax.f32 %v547_v51, 0.0 }
 0x248   :  { %v1914_v49 = vmax.f32 %v662_v23, %v663_v30  ;;  %v606_v30 = vadd.f32 %v605_v12, %v604_v55  ;;  %v610_v45 = vsub.f32 %v485_v13, %v484_v61  ;;  %v560_v51 = vadd.f32 %v1860_v32, %v559_v46 }
 0x249   :  { %v674_v42 = vrot.slane %v673_v26, 2  ;;  %v690_v48 = vrot.slane %v689_v27, 2  ;;  %v601_v38 = vadd.f32 %v600_v21, %v599_v47  ;;  %v722_v50 = vmul.f32 %v1912_v40, %v575_v22 }
 0x24a   :  { %vm666_vm7 = vcmp.eq.f32.partialorder %v1883_v59, %v1914_v49  ;;  %v607_v61 = vrot.slane %v606_v30, 1  ;;  %v581_v55 = vmax.f32 %v571_v33, 0.0  ;;  %v578_v13 = vmax.f32 %v560_v51, 0.0 }
 0x24b   :  { %v675_v52 = vadd.f32 %v674_v42, %v673_v26  ;;  %v691_v53 = vmax.f32 %v689_v27, %v690_v48  ;;  %v1230_v57 = vsel %vm666_vm7, 1.0, %v1646_v7  ;;  %v686_v43 = vsel %vm666_vm7, 0.0, %v1883_v59  ;;  %v562_v48 = vpop.f32.mrf.mxu0 }
 0x24c   :  { %v678_v63 = vsel %vm594_vm5, %v1230_v57, 0.0  ;;  %v694_v2 = vsel %vm594_vm5, %v686_v43, -inf  ;;  %v563_v57 = vadd.f32 %v1860_v32, %v562_v48  ;;  %v467_v32 = vadd.f32 %v1862_v34, %v466_v56 }
 0x24d   :  { %v676_v60 = vrot.slane %v675_v52, 1  ;;  %v692_v62 = vrot.slane %v691_v53, 1  ;;  %v679_v6 = vrot.slane %v678_v63, 4  ;;  %v695_v9 = vrot.slane %v694_v2, 4 }
 0x24e   :  { %v708_v12 = vmul.f32 %v1880_v58, %v581_v55  ;;  %v483_v20 = vmax.f32 %v467_v32, 0.0 }
 0x24f   :  { %v677_v10 = vadd.f32 %v676_v60, %v675_v52  ;;  %v693_v11 = vmax.f32 %v691_v53, %v692_v62  ;;  %v680_v17 = vadd.f32 %v679_v6, %v678_v63  ;;  %v696_v18 = vmax.f32 %v694_v2, %v695_v9 }
 0x250   :  { %v612_v53 = vmul.f32 %v610_v45, %v1880_v58  ;;  %v623_v62 = vadd.f32 %v619_v37, %v601_v38  ;;  %v624_v2 = vadd.f32 %v621_v44, %v601_v38  ;;  %v638_v6 = vmul.f32 %v1912_v40, %v479_v36  ;;  %v1356_v37 = vld [vmem:[%s2091_s12] sm:$0xff]  }
 0x251   :  { %vm701_vm8 = vcmp.gt.f32.partialorder %v677_v10, 1.0  ;;  %v681_v26 = vrot.slane %v680_v17, 2  ;;  %v697_v27 = vrot.slane %v696_v18, 2  ;;  %v464_v9 = vadd.f32 %v1862_v34, %v1905_v15 }
 0x252   :  { %v703_v23 = vsel %vm701_vm8, %v1890_v8, %v693_v11  ;;  %v616_v10 = vrot.slane %v612_v53, 2  ;;  %v579_v15 = vmax.f32 %v563_v57, 0.0  ;;  %v641_v16 = vadd.f32 %v1933_v5, %v623_v62 }
 0x253   :  { %v705_v29 = vsel %vm665_vm6, %v703_v23, %v1890_v8  ;;  %v698_v41 = vmax.f32 %v696_v18, %v697_v27  ;;  %v682_v42 = vadd.f32 %v681_v26, %v680_v17  ;;  %v642_v17 = vadd.f32 %v638_v6, %v624_v2 }
 0x254   :  { %v709_v35 = vmax.f32 %v705_v29, %v707_v24  ;;  %v635_v18 = vstv %s1326_s28  ;;  %v482_v19 = vmax.f32 %v464_v9, 0.0  ;;  %v620_v21 = vsel %vm236_vm1, 0.0, %v616_v10 }
 0x255   :  { %v699_v52 = vrot.slane %v698_v41, 1  ;;  %v683_v54 = vrot.slane %v682_v42, 1  ;;  %v622_v58 = vsel %vm239_vm2, %v616_v10, 0.0  ;;  %v723_v24 = vmul.f32 %v635_v18, %v578_v13 }
 0x256   :  { %v713_v39 = vrot.slane %v709_v35, 2  ;;  %v724_v26 = vmul.f32 %v635_v18, %v579_v15  ;;  %v1977_v27 = vmul.f32 0.25, %v641_v16  ;;  %v1979_v29 = vmul.f32 0.25, %v642_v17 }
 0x257   :  { %v684_v60 = vadd.f32 %v683_v54, %v682_v42  ;;  %v700_v46 = vmax.f32 %v698_v41, %v699_v52  ;;  %v639_v45 = vmul.f32 %v635_v18, %v482_v19  ;;  %v640_v35 = vmul.f32 %v635_v18, %v483_v20  ;;  %v960_v18 = vpop.permute.xlu1 %959 }
 0x258   :  { %v717_v43 = vsel %vm236_vm1, %v1890_v8, %v713_v39  ;;  %v719_v47 = vsel %vm239_vm2, %v713_v39, %v1890_v8  ;;  %v729_v38 = vpack.c.bf16 %v1979_v29, %v1977_v27 }
 0x259   :  { %v1957_v63 = vmax.f32 %v717_v43, %v721_v14  ;;  %v1959_v4 = vmax.f32 %v719_v47, %v722_v50  ;;  %vm702_vm9 = vcmp.gt.f32.partialorder %v684_v60, 1.0  ;;  %v608_v14 = vadd.f32 %v607_v61, %v606_v30  ;;  %v1240_v47 = vld [vmem:[%s2094_s15] ss:$0 sm:$0xff] }
 0x25a   :  { %v704_v11 = vsel %vm702_vm9, %v1914_v49, %v700_v46 }
 0x25b   :  { %v735_v8 = vpack.c.bf16 %v1959_v4, %v1957_v63  ;;  %v706_v40 = vsel %vm666_vm7, %v704_v11, %v1914_v49  ;;  %v625_v23 = vadd.f32 %v620_v21, %v608_v14  ;;  %v626_v59 = vadd.f32 %v622_v58, %v608_v14  ;;  %v964_v19 = vpop.permute.xlu1 %963 }
 0x25c   :  { %v710_v34 = vmax.f32 %v706_v40, %v708_v12  ;;  %v914_v21 = vstv %s2095_s16  ;;  %s1648_s16 = smov [#allocation21]  }
 0x25d   :  { %1311 = vmatprep.mubr.msk.bf16.mxu1 %vm288_vm4, %v735_v8  ;;  %v643_v41 = vadd.f32 %v639_v45, %v625_v23  ;;  %v644_v42 = vadd.f32 %v640_v35, %v626_v59  ;;  %s1179_s5 = sshll.u32 %s1648_s16, 4  ;;  %s1180_s5 = int_to_ptr.vmem [resolvable:$true] %s1179_s5 }
 0x25e   :  { %v714_v22 = vrot.slane %v710_v34, 2  ;;  %s1577_s4 = scalar_lea.vmem %s1180_s5, 32  ;;  %p1582_p0 = scmp.lt.s32.totalorder %s1180_s5, %s1180_s5 }
 0x25f   :  { %v2001_v50 = vmul.f32 0.25, %v644_v42  ;;  %v971_v20 = vpop.permute.xlu1 %970  ;;  %p1578_p13 = scmp.ne.s32.totalorder %s1180_s5, %s1577_s4  ;;  %p1583_p1 = scmp.lt.s32.totalorder %s1577_s4, %s1577_s4 }
 0x260   :  { %v718_v5 = vsel %vm236_vm1, %v1914_v49, %v714_v22  ;;  %v720_v30 = vsel %vm239_vm2, %v714_v22, %v1914_v49  ;;  %v1999_v49 = vmul.f32 0.25, %v643_v41  ;;  %v924_v22 = vand.u32 127, %v210_v0 }
 0x261   :  { %v1985_v33 = vmax.f32 %v718_v5, %v723_v24  ;;  %v1987_v36 = vmax.f32 %v720_v30, %v724_v26  ;;  %p1584_p2 = por %p1583_p1, %p1582_p0 }
 0x262   :  { %v730_v51 = vpack.c.bf16 %v2001_v50, %v1999_v49  ;;  %v929_v5 = vadd.s32 4294967288, %v924_v22  ;;  %v927_v41 = vsub.s32 %v924_v22, %v1798_v1 }
 0x263   :  { %v736_v48 = vpack.c.bf16 %v1987_v36, %v1985_v33  ;;  %p1585_p3 = pnand %p1584_p2, %p1578_p13 }
 0x265   :  { %1312 = vmatmul.mubr.msk.bf16.vlgmr.msra.gmra.mxu1 %vm288_vm4, %v736_v48 }
 0x266   :  { %1316 = vmatpush3.bf16.msra.mxu1 %v1849_v25  ;;  %1319 = vmatprep.mubr.msk.bf16.mxu1 %vm288_vm4, %v729_v38  ;;  %v1239_v25 = vld [vmem:[%s2093_s14] ss:$0 sm:$0xff] }
 0x267   :  { %1317 = vmatprep.subr.bf16.mxu1 %v1356_v37 }
 0x26a   :  { %1318 = vmatpush3.bf16.msra.mxu1 %v1356_v37 }
 0x26d   :  { %1320 = vmatmul.mubr.msk.bf16.vlgmr.msra.gmra.mxu1 %vm288_vm4, %v730_v51 }
 0x325   :  { %v1313_v44 = vpop.f32.mrf.mxu1 }
 0x327   :  { %v793_v39 = vpop.f32.mrf.mxu1 }
 0x329   :  { %v1314_v52 = vpop.f32.mrf.mxu1 }
 0x32b   :  { %v796_v54 = vpop.f32.mrf.mxu1 }
 0x32d   :  { %v1321_v61 = vpop.f32.mrf.mxu1 }
 0x32e   :  { %v869_v53 = vadd.f32 %v1321_v61, %v1313_v44 }
 0x32f   :  { %v860_v55 = vpop.f32.mrf.mxu1 }
 0x330   :  { %v884_v56 = vadd.f32 %v1239_v25, %v869_v53  ;;  %v861_v57 = vadd.f32 %v860_v55, %v793_v39 }
 0x331   :  { %v1322_v43 = vpop.f32.mrf.mxu1 }
 0x332   :  { %v888_v60 = vmax.f32 %v884_v56, 0.0  ;;  %v882_v46 = vadd.f32 %v1239_v25, %v861_v57  ;;  %v872_v62 = vadd.f32 %v1322_v43, %v1314_v52 }
 0x333   :  { %v863_v2 = vpop.f32.mrf.mxu1 }
 0x334   :  { %v886_v6 = vmax.f32 %v882_v46, 0.0  ;;  %v885_v9 = vadd.f32 %v1239_v25, %v872_v62  ;;  %v864_v32 = vadd.f32 %v863_v2, %v796_v54  ;;  %v899_v8 = vmul.f32 %v1240_v47, %v888_v60 }
 0x336   :  { %v889_v10 = vmax.f32 %v885_v9, 0.0  ;;  %v883_v11 = vadd.f32 %v1239_v25, %v864_v32  ;;  %v907_v12 = vsel %vm288_vm4, %v899_v8, 0.0  ;;  %v897_v13 = vmul.f32 %v1240_v47, %v886_v6 }
 0x337   :  { %908 = vadd.xlane.f32.xlu0 %v907_v12 }
 0x338   :  { %v887_v40 = vmax.f32 %v883_v11, 0.0  ;;  %v901_v14 = vsel %vm288_vm4, %v897_v13, 0.0  ;;  %v900_v15 = vmul.f32 %v1240_v47, %v889_v10 }
 0x339   :  { %902 = vadd.xlane.f32.xlu1 %v901_v14 }
 0x33a   :  { %v910_v16 = vsel %vm288_vm4, %v900_v15, 0.0  ;;  %v898_v17 = vmul.f32 %v1240_v47, %v887_v40 }
 0x33c   :  { %v904_v34 = vsel %vm288_vm4, %v898_v17, 0.0 }
 0x33d   :  { %911 = vadd.xlane.f32.xlu1 %v910_v16 }
 0x341   :  { %905 = vadd.xlane.f32.xlu1 %v904_v34 }
 0x352   :  { %974 = vbcast.lane.b32.xlu1 %v1857_v31, 264  ;;  %v2022_v31 = vsub.s32 %v929_v5, %v1798_v1 }
 0x3c0   :  { %v909_v58 = vpop.xlane.xlu0 %908 }
 0x3c1   :  { %v917_v23 = vadd.f32 %v914_v21, %v909_v58 }
 0x3c2   :  { %v903_v24 = vpop.xlane.xlu1 %902 }
 0x3c3   :  { %v982_v59 = vsub.f32 %v917_v23, %v971_v20  ;;  %v915_v26 = vadd.f32 %v914_v21, %v903_v24  ;;  %v939_v0 = vrot.slane %v917_v23, %v927_v41 }
 0x3c5   :  { %v980_v30 = vsub.f32 %v915_v26, %v960_v18  ;;  %995 = vperm.xlu1 %1346, %v982_v59   ;;  %v928_v38 = vrot.slane %v915_v26, %v927_v41 }
 0x3c6   :  { %v912_v45 = vpop.xlane.xlu1 %911 }
 0x3c7   :  { %v918_v35 = vadd.f32 %v914_v21, %v912_v45  ;;  %989 = vperm.xlu0 %1345, %v980_v30  }
 0x3c9   :  { %v943_v48 = vrot.slane %v918_v35, %v2022_v31 }
 0x3ca   :  { %v906_v42 = vpop.xlane.xlu1 %905 }
 0x3cb   :  { %v916_v37 = vadd.f32 %v914_v21, %v906_v42  ;;  %1039 = vbcast.lane.b32.xlu0 %v924_v22, 256  ;;  %v944_v54 = vsel %vm934_vm10, %v943_v48, %v939_v0  ;;  %v1095_v0 = vadd.s32 8, %v1798_v1 }
 0x3cd   :  { %v933_v51 = vrot.slane %v916_v37, %v2022_v31  ;;  %v981_v44 = vsub.f32 %v916_v37, %v964_v19 }
 0x3ce   :  { %v975_v39 = vpop.permute.xlu1 %974 }
 0x3cf   :  { %992 = vperm.xlu1 %1346, %v981_v44   ;;  %1043 = vbcast.lane.b32.xlu0 %v924_v22, 264  ;;  %v935_v52 = vsel %vm934_vm10, %v933_v51, %v928_v38  ;;  %v983_v25 = vsub.f32 %v918_v35, %v975_v39 }
 0x3d0   :  { %v946_v61 = vsel %vm945_vm11, %v944_v54, %v935_v52 }
 0x3d1   :  { %949 = vst.msk [vmem:[#allocation21] sm:$0x3] %vm948_vm12, %v946_v61 }
 0x3d3   :  { %998 = vperm.xlu1 %1346, %v983_v25  }
 0x440   :  { %v996_v53 = vpop.permute.xlu1 %995 }
 0x441   :  { %v1012_v47 = vrot.slane %v996_v53, %v927_v41 }
 0x442   :  { %v990_v56 = vpop.permute.xlu0 %989 }
 0x443   :  { %v1003_v60 = vrot.slane %v990_v56, %v927_v41 }
 0x446   :  { %v1040_v32 = vpop.permute.xlu0 %1039 }
 0x44a   :  { %v993_v55 = vpop.permute.xlu1 %992  ;;  %v1044_v13 = vpop.permute.xlu0 %1043 }
 0x44b   :  { %v1007_v57 = vrot.slane %v993_v55, %v2022_v31 }
 0x44d   :  { %v1008_v62 = vsel %vm934_vm10, %v1007_v57, %v1003_v60 }
 0x44e   :  { %v999_v43 = vpop.permute.xlu1 %998 }
 0x44f   :  { %v1016_v46 = vrot.slane %v999_v43, %v2022_v31 }
 0x451   :  { %v1017_v2 = vsel %vm934_vm10, %v1016_v46, %v1012_v47 }
 0x452   :  { %v1018_v6 = vsel %vm945_vm11, %v1017_v2, %v1008_v62 }
 0x453   :  { %v1020_v9 = vsel %vm948_vm12, %v1018_v6, -inf }
 0x454   :  { %1021 = vmax.xlane.f32.xlu1 %v1020_v9 }
 0x4dd   :  { %v1022_v8 = vpop.xlane.xlu1 %1021 }
 0x4de   :  { %v1027_v10 = vrot.slane %v1022_v8, %v1853_v28  ;;  %v1031_v12 = vrot.slane %v1022_v8, %v1805_v3 }
 0x4e0   :  { %vm1034_vm13 = vcmp.eq.f32.partialorder %v980_v30, %v1027_v10  ;;  %vm1035_vm14 = vcmp.eq.f32.partialorder %v981_v44, %v1027_v10  ;;  %vm1036_vm15 = vcmp.eq.f32.partialorder %v982_v59, %v1031_v12  ;;  %vm1037_vm0 = vcmp.eq.f32.partialorder %v983_v25, %v1031_v12 }
 0x4e1   :  { %v1045_v11 = vsel %vm1034_vm13, %v1040_v32, 16  ;;  %v1046_v40 = vsel %vm1035_vm14, %v1044_v13, 16  ;;  %v1047_v14 = vsel %vm1036_vm15, %v1040_v32, 16  ;;  %v1048_v15 = vsel %vm1037_vm0, %v1044_v13, 16 }
 0x4e2   :  { %1050 = vperm.xlu0 %1345, %v1045_v11  }
 0x4e6   :  { %1053 = vperm.xlu0 %1345, %v1046_v40  }
 0x4ea   :  { %1056 = vperm.xlu0 %1345, %v1047_v14  }
 0x4ee   :  { %1059 = vperm.xlu0 %1345, %v1048_v15  }
 0x55d   :  { %v1051_v16 = vpop.permute.xlu0 %1050 }
 0x55e   :  { %v1064_v20 = vrot.slane %v1051_v16, %v927_v41 }
 0x561   :  { %v1054_v17 = vpop.permute.xlu0 %1053 }
 0x562   :  { %v1068_v18 = vrot.slane %v1054_v17, %v2022_v31 }
 0x564   :  { %v1069_v22 = vsel %vm934_vm10, %v1068_v18, %v1064_v20 }
 0x565   :  { %v1057_v34 = vpop.permute.xlu0 %1056 }
 0x566   :  { %v1073_v21 = vrot.slane %v1057_v34, %v927_v41 }
 0x569   :  { %v1060_v19 = vpop.permute.xlu0 %1059 }
 0x56a   :  { %v1077_v58 = vrot.slane %v1060_v19, %v2022_v31 }
 0x56c   :  { %v1078_v23 = vsel %vm934_vm10, %v1077_v58, %v1073_v21 }
 0x56d   :  { %v1079_v24 = vsel %vm945_vm11, %v1078_v23, %v1069_v22 }
 0x56e   :  { %v1080_v59 = vsel %vm948_vm12, %v1079_v24, 2147483647 }
 0x56f   :  { %v1082_v26 = vshra.s32 %v1080_v59, 16  ;;  %v1081_v30 = vand.u32 65535, %v1080_v59 }
 0x571   :  { %v1084_v5 = vcvt.s32.f32 %v1082_v26  ;;  %v1083_v35 = vcvt.s32.f32 %v1081_v30 }
 0x573   :  { %1085 = vmin.xlane.f32.xlu0 %v1084_v5 }
 0x5fc   :  { %v1086_v45 = vpop.xlane.xlu0 %1085 }
 0x5fd   :  { %vm1087_vm1 = vcmp.eq.f32.partialorder %v1084_v5, %v1086_v45  ;;  %v1092_v41 = vcvt.f32.s32 %v1086_v45 }
 0x5fe   :  { %v1088_v42 = vsel %vm1087_vm1, %v1083_v35, inf }
 0x5ff   :  { %1089 = vmin.xlane.f32.xlu1 %v1088_v42  ;;  %v1093_v31 = vshll.u32 %v1092_v41, 16 }
 0x688   :  { %v1090_v48 = vpop.xlane.xlu1 %1089 }
 0x689   :  { %v1091_v37 = vcvt.f32.s32 %v1090_v48 }
 0x68b   :  { %v1094_v38 = vadd.s32 %v1093_v31, %v1091_v37 }
 0x68d   :  { %v1099_v51 = vrot.slane %v1094_v38, %v1853_v28  ;;  %v1103_v44 = vrot.slane %v1094_v38, %v1805_v3 }
 0x68f   :  { %vm1104_vm2 = vcmp.eq.s32.totalorder %v1798_v1, %v1099_v51  ;;  %vm1105_vm3 = vcmp.eq.s32.totalorder %v1095_v0, %v1099_v51  ;;  %vm1106_vm5 = vcmp.eq.s32.totalorder %v1798_v1, %v1103_v44  ;;  %vm1107_vm6 = vcmp.eq.s32.totalorder %v1095_v0, %v1103_v44 }
 0x690   :  { %v1241_v39 = vsel %vm1104_vm2, 1.0, %v1646_v7  ;;  %v1242_v52 = vsel %vm1105_vm3, 1.0, %v1646_v7  ;;  %v1243_v54 = vsel %vm1106_vm5, 1.0, %v1646_v7  ;;  %v1244_v61 = vsel %vm1107_vm6, 1.0, %v1646_v7 }
 0x691   :  { %v1116_v25 = vmul.f32 %v1241_v39, %v1977_v27  ;;  %v1117_v28 = vmul.f32 %v1242_v52, %v1979_v29  ;;  %v1118_v3 = vmul.f32 %v1243_v54, %v1999_v49  ;;  %v1119_v53 = vmul.f32 %v1244_v61, %v2001_v50 }
 0x692   :  { %v1138_v55 = vmul.f32 %v1241_v39, %v1957_v63  ;;  %v1139_v1 = vmul.f32 %v1242_v52, %v1959_v4  ;;  %v1140_v56 = vmul.f32 %v1243_v54, %v1985_v33  ;;  %v1141_v57 = vmul.f32 %v1244_v61, %v1987_v36 }
 0x693   :  { %v1120_v43 = vsel %vm288_vm4, %v1116_v25, 0.0  ;;  %v1121_v7 = vsel %vm288_vm4, %v1117_v28, 0.0  ;;  %v1129_v27 = vsel %vm288_vm4, %v1118_v3, 0.0  ;;  %v1130_v29 = vsel %vm288_vm4, %v1119_v53, 0.0 }
 0x694   :  { %v1122_v47 = vadd.f32 %v1121_v7, %v1120_v43  ;;  %v1131_v49 = vadd.f32 %v1130_v29, %v1129_v27  ;;  %v1142_v50 = vsel %vm288_vm4, %v1138_v55, 0.0  ;;  %v1143_v63 = vsel %vm288_vm4, %v1139_v1, 0.0 }
 0x695   :  { %v1144_v60 = vadd.f32 %v1143_v63, %v1142_v50  ;;  %v1151_v4 = vsel %vm288_vm4, %v1140_v56, 0.0  ;;  %v1152_v33 = vsel %vm288_vm4, %v1141_v57, 0.0 }
 0x696   :  { %v1123_v36 = vrot.slane %v1122_v47, 4  ;;  %v1132_v46 = vrot.slane %v1131_v49, 4  ;;  %v1153_v62 = vadd.f32 %v1152_v33, %v1151_v4 }
 0x697   :  { %v1145_v2 = vrot.slane %v1144_v60, 4 }
 0x698   :  { %v1154_v6 = vrot.slane %v1153_v62, 4  ;;  %v1133_v9 = vadd.f32 %v1132_v46, %v1131_v49  ;;  %v1124_v32 = vadd.f32 %v1123_v36, %v1122_v47 }
 0x699   :  { %v1146_v8 = vadd.f32 %v1145_v2, %v1144_v60 }
 0x69a   :  { %v1155_v10 = vadd.f32 %v1154_v6, %v1153_v62  ;;  %v1134_v11 = vrot.slane %v1133_v9, 2  ;;  %v1125_v12 = vrot.slane %v1124_v32, 2 }
 0x69b   :  { %v1147_v13 = vrot.slane %v1146_v8, 2 }
 0x69c   :  { %1588 = shalt.err (!%p1585_p3)
}
 0x69d   :  { %1182 = dma.vmem_to_hbm [thread:$0]  %s1180_s5, 32, %s2096_s17, [#allocation5]   ;;  %v1156_v40 = vrot.slane %v1155_v10, 2  ;;  %v1135_v14 = vadd.f32 %v1134_v11, %v1133_v9  ;;  %v1126_v15 = vadd.f32 %v1125_v12, %v1124_v32  ;;  %v1148_v16 = vadd.f32 %v1147_v13, %v1146_v8 }
 0x69e   :  { %s1649_s11 = smov 32   ;;  %s1650_s17 = smov [#allocation22]   ;;  %vm1171_vm7 = vcmask 517120  }
 0x69f   :  { %v1157_v17 = vadd.f32 %v1156_v40, %v1155_v10  ;;  %v1136_v34 = vrot.slane %v1135_v14, 1  ;;  %v1127_v18 = vrot.slane %v1126_v15, 1  ;;  %v1149_v19 = vrot.slane %v1148_v16, 1  ;;  %s1189_s23 = sshll.u32 %s1650_s17, 4  ;;  %s1190_s23 = int_to_ptr.vmem [resolvable:$true] %s1189_s23 }
 0x6a0   :  { %s1597_s8 = scalar_lea.vmem %s1190_s23, 32  ;;  %p1602_p5 = scmp.lt.s32.totalorder %s1190_s23, %s1190_s23 }
 0x6a1   :  { %v1158_v20 = vrot.slane %v1157_v17, 1  ;;  %v1137_v21 = vadd.f32 %v1136_v34, %v1135_v14  ;;  %v1128_v58 = vadd.f32 %v1127_v18, %v1126_v15  ;;  %v1150_v22 = vadd.f32 %v1149_v19, %v1148_v16  ;;  %p1598_p4 = scmp.ne.s32.totalorder %s1190_s23, %s1597_s8  ;;  %p1603_p6 = scmp.lt.s32.totalorder %s1597_s8, %s1597_s8 }
 0x6a3   :  { %v1159_v23 = vadd.f32 %v1158_v20, %v1157_v17  ;;  %v1162_v24 = vsel %vm945_vm11, %v1137_v21, %v1128_v58  ;;  %p1604_p7 = por %p1603_p6, %p1602_p5 }
 0x6a5   :  { %v1166_v59 = vsel %vm945_vm11, %v1159_v23, %v1150_v22  ;;  %p1605_p8 = pnand %p1604_p7, %p1598_p4 }
 0x6a6   :  { %1167 = vrot.lane.b32.xlu1 %v1166_v59, %s1649_s11 }
 0x718   :  { %v1168_v26 = vpop.permute.xlu1 %1167 }
 0x719   :  { %v1170_v5 = vsel %vm288_vm4, %v1162_v24, %v1168_v26 }
 0x71a   :  { %1172 = vst.msk [vmem:[#allocation22] sm:$0x3] %vm1171_vm7, %v1170_v5 }
 0x71b   :  { %1608 = shalt.err (!%p1605_p8)
}
 0x71c   :  { %1192 = dma.vmem_to_hbm [thread:$0]  %s1190_s23, 32, %s2097_s18, [#allocation23]  }
 0x71d   :  { %1629 = dma.done.wait [#allocation5], 32  }
 0x71e   :  { %1630 = vsyncadd [#allocation5], 4294967264 }
 0x71f   :  { %1631 = dma.done.wait [#allocation23], 32  }
 0x720   :  { %1632 = vsyncadd [#allocation23], 4294967264 }
 0x721   :  { %1199 = vsyncpa [#allocation4], 1 }
 0x722   :  { %1200 = vsyncpa [#allocation7], 1 }
 0x723   :  { %1201 = vsyncpa [#allocation10], 1 }
 0x724   :  { %1202 = vsyncpa [#allocation13], 1 }
 0x725   :  { %1203 = vsyncpa [#allocation16], 1 }
 0x726   :  { %1204 = vsyncpa [#allocation19], 1 }
 0x727   :  { %1205 = vsyncpa [#allocation5], 1 }
 0x728   :  { %1206 = vsyncpa [#allocation23], 1 }

</bundles_post_ra>
